<compile_context>
chip_gen: v6e
topology: v6e:2x2x1
jax: 0.10.0
libtpu: 0.0.40
codegen_flags: <defaults>
</compile_context>

<pallas_src>
import functools

import jax
import jax.numpy as jnp
from jax import lax
from jax.experimental import pallas as pl
from jax.experimental.pallas import tpu as pltpu


def _round_up(x, m):
    return ((x + m - 1) // m) * m


def _default_num_chunks():
    # Two TensorCores share the ("parallel", ...) grid axis only on megacore
    # parts (v4/v5p) and v7x.  On single-TC chips (v5e/v6e) an extra chunk only
    # adds a potentially fully-padded tile of wasted MXU work.
    try:
        kind = jax.devices()[0].device_kind.lower()
    except Exception:
        return 1
    return 2 if any(tag in kind for tag in ("v7", "v5p", "v4")) else 1


def _quantizer_kernel(x_ref, wp_ref, bp_ref, embnt_ref, embwe_ref, be_ref,
                      out_ref, idx_ref, sse_ref, counts_ref,
                      sse_acc, counts_acc, *, m_actual, nc):
    c = pl.program_id(0)          # chunk (megacore "parallel" axis)
    s = pl.program_id(1)          # sequential step within the chunk

    @pl.when(s == 0)
    def _():
        sse_acc[...] = jnp.zeros_like(sse_acc)
        counts_acc[...] = jnp.zeros_like(counts_acc)

    tm = x_ref.shape[0]
    row0 = (s * nc + c) * tm      # interleaved tile mapping (balanced chunks)

    # projection 1x1 conv == matmul + bias (MXU).  The weight dtype selects the
    # matmul path (f32 exact / bf16 fast); accumulation stays f32.
    x = x_ref[...].astype(wp_ref.dtype)
    proj = jnp.dot(x, wp_ref[...], preferred_element_type=jnp.float32) + bp_ref[...]

    # F.normalize(eps=1e-6): x / max(||x||, 1e-6) == x * rsqrt(max(||x||^2, 1e-12))
    ss = jnp.sum(proj * proj, axis=1, keepdims=True)
    enc = proj * lax.rsqrt(jnp.maximum(ss, 1e-12))                     # (tm, Fd), f32

    # cosine similarities vs the pre-normalized, pre-transposed codebook.
    # (tm, Fd) x (Fd, N) -> (tm, N); kept in f32 for bit-stable argmax.
    sim = jnp.dot(enc, embnt_ref[...], preferred_element_type=jnp.float32)

    idx = jnp.argmax(sim, axis=1).astype(jnp.int32)                    # (tm,)
    idx_ref[...] = idx[None, None, :]                                  # lane-dense store

    iota_n = lax.broadcasted_iota(jnp.int32, sim.shape, 1)
    onehot = (iota_n == idx[:, None]).astype(jnp.float32)              # (tm, N)

    # mask padded rows (global row >= m_actual) out of the statistics
    rows = row0 + lax.broadcasted_iota(jnp.int32, (tm, 1), 0)
    valid = (rows < m_actual).astype(jnp.float32)                      # (tm, 1)

    # enc rows and codebook rows are unit norm (up to the 1e-6 clamp), so
    # ||enc - e[argmax]||^2 == 2 - 2*max(sim): no gathered latent needed.
    max_sim = jnp.max(sim, axis=1, keepdims=True)
    sse_acc[...] += jnp.sum(valid * (2.0 - 2.0 * max_sim))
    counts_acc[...] += jnp.sum(onehot * valid, axis=0)[None, :]

    # fused codebook gather + expansion 1x1 conv (straight-through forward
    # value): out = onehot @ (emb_n @ we) + be  -- a single MXU pass.
    out = jnp.dot(onehot.astype(embwe_ref.dtype), embwe_ref[...],
                  preferred_element_type=jnp.float32) + be_ref[...]
    out_ref[...] = out.astype(out_ref.dtype)

    @pl.when(s == pl.num_programs(1) - 1)
    def _():
        sse_ref[...] = sse_acc[...][None]          # (1, 1, 1)
        counts_ref[...] = counts_acc[...][None]    # (1, 1, N)


def vqgan_quantize(x, wp, bp, emb, we, be, *, tm=2048, num_chunks=None,
                   use_bf16=False):
    """x: (B, Dc, H, W) NCHW.  wp: (Dc, Fd), bp: (1, Fd), emb: (N, Fd),
    we: (Fd, Dc), be: (1, Dc).  Returns (latents NCHW, indices, loss, ppl)."""
    B, Dc, H, W = x.shape
    N, Fd = emb.shape
    M = B * H * W

    mm_dtype = jnp.bfloat16 if use_bf16 else jnp.float32

    # Grid-invariant codebook prep, hoisted out of the kernel:
    #   emb_n  = normalize(emb)        emb_nt = emb_n.T   (lane-dense sim RHS)
    #   emb_we = emb_n @ we            (fused gather+expansion table)
    emb32 = emb.astype(jnp.float32)
    emb_n = emb32 * lax.rsqrt(
        jnp.maximum(jnp.sum(emb32 * emb32, axis=1, keepdims=True), 1e-12))
    emb_nt = emb_n.T                                                   # (Fd, N) f32
    emb_we = jnp.dot(emb_n, we.astype(jnp.float32),
                     preferred_element_type=jnp.float32).astype(mm_dtype)  # (N, Dc)
    wp_mm = wp.astype(mm_dtype)
    bp32 = bp.astype(jnp.float32)
    be32 = be.astype(jnp.float32)

    xt = jnp.transpose(x, (0, 2, 3, 1)).reshape(M, Dc).astype(mm_dtype)

    if num_chunks is None:
        num_chunks = _default_num_chunks()

    # Tile / grid layout: big tiles, padded + masked remainder, per-chunk
    # partial accumulators so the leading grid axis can be "parallel".
    tm_eff = max(8, min(_round_up(tm, 8), _round_up(M, 8)))
    total_tiles = -(-M // tm_eff)
    nc = max(1, min(num_chunks, total_tiles))
    steps = -(-total_tiles // nc)
    num_tiles = nc * steps
    m_pad = num_tiles * tm_eff
    if m_pad != M:
        xt = jnp.pad(xt, ((0, m_pad - M), (0, 0)))

    kernel = functools.partial(_quantizer_kernel, m_actual=M, nc=nc)

    flops = 2 * M * (Dc * Fd + Fd * N + N * Dc)
    bytes_accessed = (xt.dtype.itemsize * m_pad * Dc            # token tiles in
                      + x.dtype.itemsize * m_pad * Dc           # latents out
                      + 4 * (Dc * Fd + Fd * N + N * Dc + m_pad + N))

    out, idx, sse, counts = pl.pallas_call(
        kernel,
        out_shape=(
            jax.ShapeDtypeStruct((m_pad, Dc), x.dtype),               # expanded latents
            jax.ShapeDtypeStruct((num_tiles, 1, tm_eff), jnp.int32),  # indices (lane-dense)
            jax.ShapeDtypeStruct((nc, 1, 1), jnp.float32),            # per-chunk SSE partials
            jax.ShapeDtypeStruct((nc, 1, N), jnp.float32),            # per-chunk usage counts
        ),
        grid_spec=pltpu.PrefetchScalarGridSpec(
            num_scalar_prefetch=0,
            grid=(nc, steps),
            in_specs=[
                pl.BlockSpec((tm_eff, Dc), lambda c, s: (s * nc + c, 0)),  # tokens
                pl.BlockSpec((Dc, Fd), lambda c, s: (0, 0)),               # projection weight
                pl.BlockSpec((1, Fd), lambda c, s: (0, 0)),                # projection bias
                pl.BlockSpec((Fd, N), lambda c, s: (0, 0)),                # normalized codebook^T
                pl.BlockSpec((N, Dc), lambda c, s: (0, 0)),                # fused emb_n @ we
                pl.BlockSpec((1, Dc), lambda c, s: (0, 0)),                # expansion bias
            ],
            out_specs=[
                pl.BlockSpec((tm_eff, Dc), lambda c, s: (s * nc + c, 0)),
                pl.BlockSpec((1, 1, tm_eff), lambda c, s: (s * nc + c, 0, 0)),
                pl.BlockSpec((1, 1, 1), lambda c, s: (c, 0, 0)),
                pl.BlockSpec((1, 1, N), lambda c, s: (c, 0, 0)),
            ],
            scratch_shapes=[
                pltpu.VMEM((1, 1), jnp.float32),   # SSE accumulator
                pltpu.VMEM((1, N), jnp.float32),   # usage-count accumulator
            ],
        ),
        compiler_params=pltpu.CompilerParams(
            dimension_semantics=("parallel", "arbitrary")),
        cost_estimate=pl.CostEstimate(
            flops=flops, transcendentals=M, bytes_accessed=bytes_accessed),
    )(xt, wp_mm, bp32, emb_nt, emb_we, be32)

    latents = jnp.transpose(out[:M].reshape(B, H, W, Dc), (0, 3, 1, 2))
    closest_indices = idx.reshape(-1)[:M].reshape(B, H, W)
    sse_total = jnp.sum(sse)
    counts_total = jnp.sum(counts.reshape(nc, N), axis=0)
    loss_quantization = sse_total / (M * Fd)
    usage = counts_total / M
    perplexity = jnp.exp(jnp.sum(-usage * jnp.log(usage + 1e-6)))
    # TODO(synk): straight-through estimator (detach) only affects backward;
    # the forward value computed here is identical to the PyTorch module.
    return latents, closest_indices, loss_quantization, perplexity


def _reference(x, wp, bp, emb, we, be):
    """Pure-JAX reference mirroring the PyTorch forward."""
    B, Dc, H, W = x.shape
    N, Fd = emb.shape
    proj = jnp.einsum('bchw,cf->bfhw', x, wp) + bp[0][None, :, None, None]
    enc = proj / jnp.maximum(
        jnp.sqrt(jnp.sum(proj * proj, axis=1, keepdims=True)), 1e-6)
    en = emb / jnp.maximum(
        jnp.sqrt(jnp.sum(emb * emb, axis=1, keepdims=True)), 1e-6)
    sim = jnp.einsum('bdhw,nd->bnhw', enc, en)
    idx = jnp.argmax(sim, axis=1)
    lat = jnp.transpose(en[idx], (0, 3, 1, 2))
    loss = jnp.mean((enc - lat) ** 2)
    out = jnp.einsum('bfhw,fd->bdhw', lat, we) + be[0][None, :, None, None]
    flat = idx.reshape(-1)
    counts = jnp.zeros((N,), jnp.float32).at[flat].add(1.0)
    usage = counts / flat.size
    ppl = jnp.exp(jnp.sum(-usage * jnp.log(usage + 1e-6)))
    return out, idx, loss, ppl


if __name__ == "__main__":
    # Small, module-consistent shapes:
    #   num_embeddings=256, embedding_dim=128, factorized_dim=32
    # H=W=12 gives M=288 tokens, exercising the padding/masking and
    # multi-chunk (per-core partial, interleaved tile) paths with tm=128.
    B, Dc, H, W = 2, 128, 12, 12
    N, Fd = 256, 32

    key = jax.random.PRNGKey(0)
    k = jax.random.split(key, 6)
    x = jax.random.normal(k[0], (B, Dc, H, W), jnp.float32)
    # projection.weight (Fd, Dc, 1, 1) stored transposed as (Dc, Fd)
    wp = jax.random.normal(k[1], (Dc, Fd), jnp.float32) * 0.05
    bp = jax.random.normal(k[2], (1, Fd), jnp.float32) * 0.01
    # embeddings.weight (N, Fd)
    emb = jax.random.normal(k[3], (N, Fd), jnp.float32)
    # expansion.weight (Dc, Fd, 1, 1) stored transposed as (Fd, Dc)
    we = jax.random.normal(k[4], (Fd, Dc), jnp.float32) * 0.05
    be = jax.random.normal(k[5], (1, Dc), jnp.float32) * 0.01

    r_lat, r_idx, r_loss, r_ppl = _reference(x, wp, bp, emb, we, be)

    # small-tile / multi-chunk f32 path (padding + interleaved per-chunk partials)
    run_small = jax.jit(functools.partial(vqgan_quantize, tm=128, num_chunks=2))
    latents, indices, loss, ppl = run_small(x, wp, bp, emb, we, be)
    jax.block_until_ready((latents, indices, loss, ppl))

    assert latents.shape == (B, Dc, H, W)
    assert indices.shape == (B, H, W)
    assert jnp.allclose(latents, r_lat, atol=1e-4, rtol=1e-4)
    assert bool(jnp.all(indices == r_idx.astype(jnp.int32)))
    assert jnp.allclose(loss, r_loss, atol=1e-4, rtol=1e-4)
    assert jnp.allclose(ppl, r_ppl, atol=1e-3, rtol=1e-3)

    # default path (tm=2048 -> single tile at these shapes, auto chunk count)
    latents2, indices2, loss2, ppl2 = jax.jit(vqgan_quantize)(x, wp, bp, emb, we, be)
    jax.block_until_ready((latents2, indices2, loss2, ppl2))
    assert jnp.allclose(latents2, r_lat, atol=1e-4, rtol=1e-4)
    assert bool(jnp.all(indices2 == r_idx.astype(jnp.int32)))
    assert jnp.allclose(loss2, r_loss, atol=1e-4, rtol=1e-4)
    assert jnp.allclose(ppl2, r_ppl, atol=1e-3, rtol=1e-3)

    # bf16 matmul-operand smoke test (sim matmul stays f32); loose checks only,
    # since bf16 operands legitimately perturb the numerics vs the f32 module.
    run_bf16 = jax.jit(functools.partial(vqgan_quantize, tm=128, use_bf16=True))
    latents3, indices3, loss3, ppl3 = run_bf16(x, wp, bp, emb, we, be)
    jax.block_until_ready((latents3, indices3, loss3, ppl3))
    assert latents3.shape == (B, Dc, H, W) and indices3.shape == (B, H, W)
    assert bool(jnp.all(jnp.isfinite(latents3)))
    assert bool(jnp.isfinite(loss3)) and bool(jnp.abs(loss3 - r_loss) < 5e-2)

    print("KERNEL_OK")
</pallas_src>

<mosaic_0001>
module attributes {stable_mosaic.version = 11 : i64} {
  func.func @_quantizer_kernel(%arg0: i32, %arg1: i32, %arg2: memref<128x128xf32, #tpu.memory_space<vmem>>, %arg3: memref<128x32xf32, #tpu.memory_space<vmem>>, %arg4: memref<1x32xf32, #tpu.memory_space<vmem>>, %arg5: memref<32x256xf32, #tpu.memory_space<vmem>>, %arg6: memref<256x128xf32, #tpu.memory_space<vmem>>, %arg7: memref<1x128xf32, #tpu.memory_space<vmem>>, %arg8: memref<128x128xf32, #tpu.memory_space<vmem>>, %arg9: memref<1x1x128xi32, #tpu.memory_space<vmem>>, %arg10: memref<1x1x1xf32, #tpu.memory_space<vmem>>, %arg11: memref<1x1x256xf32, #tpu.memory_space<vmem>>, %arg12: memref<1x1xf32, #tpu.memory_space<vmem>>, %arg13: memref<1x256xf32, #tpu.memory_space<vmem>>) attributes {dimension_semantics = [#tpu.dimension_semantics<parallel>, #tpu.dimension_semantics<arbitrary>], iteration_bounds = array<i64: 2, 2>, scalar_prefetch = 0 : i64, scratch_operands = 2 : i64, tpu.core_type = #tpu.core_type<tc>, window_params = [{transform_indices = @transform_0, window_bounds = array<i64: 128, 128>}, {pipeline_mode = #tpu.pipeline_mode<synchronous>, transform_indices = @transform_1, window_bounds = array<i64: 128, 32>}, {pipeline_mode = #tpu.pipeline_mode<synchronous>, transform_indices = @transform_2, window_bounds = array<i64: 1, 32>}, {pipeline_mode = #tpu.pipeline_mode<synchronous>, transform_indices = @transform_3, window_bounds = array<i64: 32, 256>}, {pipeline_mode = #tpu.pipeline_mode<synchronous>, transform_indices = @transform_4, window_bounds = array<i64: 256, 128>}, {pipeline_mode = #tpu.pipeline_mode<synchronous>, transform_indices = @transform_5, window_bounds = array<i64: 1, 128>}, {transform_indices = @transform_6, window_bounds = array<i64: 128, 128>}, {transform_indices = @transform_7, window_bounds = array<i64: 1, 1, 128>}, {transform_indices = @transform_8, window_bounds = array<i64: 1, 1, 1>}, {transform_indices = @transform_9, window_bounds = array<i64: 1, 1, 256>}]} {
    %c0_i32 = arith.constant 0 : i32
    %0 = arith.cmpi eq, %arg1, %c0_i32 : i32
    %1 = arith.extui %0 : i1 to i32
    %c0_i32_0 = arith.constant 0 : i32
    %2 = arith.cmpi ne, %1, %c0_i32_0 : i32
    scf.if %2 {
      %cst_35 = arith.constant 0.000000e+00 : f32
      %69 = vector.broadcast %cst_35 : f32 to vector<1x1xf32>
      %c0_36 = arith.constant 0 : index
      %c0_37 = arith.constant 0 : index
      %70 = vector.load %arg12[%c0_36, %c0_37] : memref<1x1xf32, #tpu.memory_space<vmem>>, vector<1x1xf32>
      tpu.vector_store %arg12[%c0_36, %c0_37], %69 {strides = array<i32>} : memref<1x1xf32, #tpu.memory_space<vmem>>, vector<1x1xf32>,
      %cst_38 = arith.constant 0.000000e+00 : f32
      %71 = vector.broadcast %cst_38 : f32 to vector<1x256xf32>
      %c0_39 = arith.constant 0 : index
      %c0_40 = arith.constant 0 : index
      %72 = vector.load %arg13[%c0_39, %c0_40] : memref<1x256xf32, #tpu.memory_space<vmem>>, vector<1x256xf32>
      tpu.vector_store %arg13[%c0_39, %c0_40], %71 {strides = array<i32>} : memref<1x256xf32, #tpu.memory_space<vmem>>, vector<1x256xf32>,
    } else {
    }
    %c2_i32 = arith.constant 2 : i32
    %3 = arith.muli %arg1, %c2_i32 : i32
    %4 = arith.addi %3, %arg0 : i32
    %c128_i32 = arith.constant 128 : i32
    %5 = arith.muli %4, %c128_i32 : i32
    %c0 = arith.constant 0 : index
    %c0_1 = arith.constant 0 : index
    %6 = vector.load %arg2[%c0, %c0_1] : memref<128x128xf32, #tpu.memory_space<vmem>>, vector<128x128xf32>
    %c0_2 = arith.constant 0 : index
    %c0_3 = arith.constant 0 : index
    %7 = vector.load %arg3[%c0_2, %c0_3] : memref<128x32xf32, #tpu.memory_space<vmem>>, vector<128x32xf32>
    %cst = arith.constant dense<0.000000e+00> : vector<128x32xf32>
    %8 = tpu.matmul %6, %7, %cst {dimension_numbers = #tpu.dot_dimension_numbers<[1], [0], [0], [1], [0, 0, 1, 1], [], []>} : vector<128x128xf32>, vector<128x32xf32>, vector<128x32xf32> -> vector<128x32xf32>
    %c0_4 = arith.constant 0 : index
    %c0_5 = arith.constant 0 : index
    %9 = vector.load %arg4[%c0_4, %c0_5] : memref<1x32xf32, #tpu.memory_space<vmem>>, vector<1x32xf32>
    %10 = vector.broadcast %9 : vector<1x32xf32> to vector<128x32xf32>
    %11 = arith.addf %8, %10 : vector<128x32xf32>
    %12 = arith.mulf %11, %11 : vector<128x32xf32>
    %cst_6 = arith.constant dense<0.000000e+00> : vector<128xf32>
    %13 = vector.multi_reduction <add>, %12, %cst_6 [1] : vector<128x32xf32> to vector<128xf32>
    %14 = vector.shape_cast %13 : vector<128xf32> to vector<128x1xf32>
    %cst_7 = arith.constant 9.99999996E-13 : f32
    %15 = vector.broadcast %cst_7 : f32 to vector<128x1xf32>
    %16 = arith.maximumf %14, %15 : vector<128x1xf32>
    %17 = math.rsqrt %16 : vector<128x1xf32>
    %18 = vector.broadcast %17 : vector<128x1xf32> to vector<128x32xf32>
    %19 = arith.mulf %11, %18 : vector<128x32xf32>
    %c0_8 = arith.constant 0 : index
    %c0_9 = arith.constant 0 : index
    %20 = vector.load %arg5[%c0_8, %c0_9] : memref<32x256xf32, #tpu.memory_space<vmem>>, vector<32x256xf32>
    %cst_10 = arith.constant dense<0.000000e+00> : vector<128x256xf32>
    %21 = tpu.matmul %19, %20, %cst_10 {dimension_numbers = #tpu.dot_dimension_numbers<[1], [0], [0], [1], [0, 0, 1, 1], [], []>} : vector<128x32xf32>, vector<32x256xf32>, vector<128x256xf32> -> vector<128x256xf32>
    %22 = tpu.reduce_index %21 {axis = 1 : i32, kind = #tpu.reduction_kind<arg_max>} : vector<128x256xf32> -> vector<128xi32>
    %23 = vector.shape_cast %22 : vector<128xi32> to vector<1x1x128xi32>
    %c0_11 = arith.constant 0 : index
    %c0_12 = arith.constant 0 : index
    %c0_13 = arith.constant 0 : index
    %24 = vector.load %arg9[%c0_11, %c0_12, %c0_13] : memref<1x1x128xi32, #tpu.memory_space<vmem>>, vector<1x1x128xi32>
    tpu.vector_store %arg9[%c0_11, %c0_12, %c0_13], %23 {strides = array<i32>} : memref<1x1x128xi32, #tpu.memory_space<vmem>>, vector<1x1x128xi32>,
    %25 = tpu.iota {dimensions = array<i32: 1>} : vector<128x256xi32>
    %26 = vector.shape_cast %22 : vector<128xi32> to vector<128x1xi32>
    %27 = vector.broadcast %26 : vector<128x1xi32> to vector<128x256xi32>
    %28 = arith.cmpi eq, %25, %27 : vector<128x256xi32>
    %29 = arith.extui %28 : vector<128x256xi1> to vector<128x256xi32>
    %30 = arith.sitofp %29 : vector<128x256xi32> to vector<128x256xf32>
    %31 = tpu.iota {dimensions = array<i32: 0>} : vector<128x1xi32>
    %32 = vector.broadcast %5 : i32 to vector<128x1xi32>
    %33 = arith.addi %32, %31 : vector<128x1xi32>
    %c288_i32 = arith.constant 288 : i32
    %34 = vector.broadcast %c288_i32 : i32 to vector<128x1xi32>
    %35 = arith.cmpi slt, %33, %34 : vector<128x1xi32>
    %36 = arith.extui %35 : vector<128x1xi1> to vector<128x1xi32>
    %37 = arith.sitofp %36 : vector<128x1xi32> to vector<128x1xf32>
    %cst_14 = arith.constant dense<0xFF800000> : vector<128xf32>
    %38 = vector.multi_reduction <maximumf>, %21, %cst_14 [1] : vector<128x256xf32> to vector<128xf32>
    %39 = vector.shape_cast %38 : vector<128xf32> to vector<128x1xf32>
    %c0_15 = arith.constant 0 : index
    %c0_16 = arith.constant 0 : index
    %40 = vector.load %arg12[%c0_15, %c0_16] : memref<1x1xf32, #tpu.memory_space<vmem>>, vector<1x1xf32>
    %cst_17 = arith.constant 2.000000e+00 : f32
    %41 = vector.broadcast %cst_17 : f32 to vector<128x1xf32>
    %42 = arith.mulf %41, %39 : vector<128x1xf32>
    %cst_18 = arith.constant 2.000000e+00 : f32
    %43 = vector.broadcast %cst_18 : f32 to vector<128x1xf32>
    %44 = arith.subf %43, %42 : vector<128x1xf32>
    %45 = arith.mulf %37, %44 : vector<128x1xf32>
    %46 = vector.shape_cast %45 : vector<128x1xf32> to vector<1x128x1xf32>
    %cst_19 = arith.constant dense<0.000000e+00> : vector<1xf32>
    %47 = vector.multi_reduction <add>, %46, %cst_19 [1, 2] : vector<1x128x1xf32> to vector<1xf32>
    %48 = vector.shape_cast %47 : vector<1xf32> to vector<1x1x1xf32>
    %49 = vector.extract %48[0, 0, 0] : f32 from vector<1x1x1xf32>
    %50 = vector.broadcast %49 : f32 to vector<1x1xf32>
    %51 = arith.addf %40, %50 : vector<1x1xf32>
    %c0_20 = arith.constant 0 : index
    %c0_21 = arith.constant 0 : index
    %52 = vector.load %arg12[%c0_20, %c0_21] : memref<1x1xf32, #tpu.memory_space<vmem>>, vector<1x1xf32>
    tpu.vector_store %arg12[%c0_20, %c0_21], %51 {strides = array<i32>} : memref<1x1xf32, #tpu.memory_space<vmem>>, vector<1x1xf32>,
    %c0_22 = arith.constant 0 : index
    %c0_23 = arith.constant 0 : index
    %53 = vector.load %arg13[%c0_22, %c0_23] : memref<1x256xf32, #tpu.memory_space<vmem>>, vector<1x256xf32>
    %54 = vector.broadcast %37 : vector<128x1xf32> to vector<128x256xf32>
    %55 = arith.mulf %30, %54 : vector<128x256xf32>
    %cst_24 = arith.constant dense<0.000000e+00> : vector<256xf32>
    %56 = vector.multi_reduction <add>, %55, %cst_24 [0] : vector<128x256xf32> to vector<256xf32>
    %57 = vector.shape_cast %56 : vector<256xf32> to vector<1x256xf32>
    %58 = arith.addf %53, %57 : vector<1x256xf32>
    %c0_25 = arith.constant 0 : index
    %c0_26 = arith.constant 0 : index
    %59 = vector.load %arg13[%c0_25, %c0_26] : memref<1x256xf32, #tpu.memory_space<vmem>>, vector<1x256xf32>
    tpu.vector_store %arg13[%c0_25, %c0_26], %58 {strides = array<i32>} : memref<1x256xf32, #tpu.memory_space<vmem>>, vector<1x256xf32>,
    %c0_27 = arith.constant 0 : index
    %c0_28 = arith.constant 0 : index
    %60 = vector.load %arg6[%c0_27, %c0_28] : memref<256x128xf32, #tpu.memory_space<vmem>>, vector<256x128xf32>
    %cst_29 = arith.constant dense<0.000000e+00> : vector<128x128xf32>
    %61 = tpu.matmul %30, %60, %cst_29 {dimension_numbers = #tpu.dot_dimension_numbers<[1], [0], [0], [1], [0, 0, 1, 1], [], []>} : vector<128x256xf32>, vector<256x128xf32>, vector<128x128xf32> -> vector<128x128xf32>
    %c0_30 = arith.constant 0 : index
    %c0_31 = arith.constant 0 : index
    %62 = vector.load %arg7[%c0_30, %c0_31] : memref<1x128xf32, #tpu.memory_space<vmem>>, vector<1x128xf32>
    %63 = vector.broadcast %62 : vector<1x128xf32> to vector<128x128xf32>
    %64 = arith.addf %61, %63 : vector<128x128xf32>
    %c0_32 = arith.constant 0 : index
    %c0_33 = arith.constant 0 : index
    %65 = vector.load %arg8[%c0_32, %c0_33] : memref<128x128xf32, #tpu.memory_space<vmem>>, vector<128x128xf32>
    tpu.vector_store %arg8[%c0_32, %c0_33], %64 {strides = array<i32>} : memref<128x128xf32, #tpu.memory_space<vmem>>, vector<128x128xf32>,
    %c1_i32 = arith.constant 1 : i32
    %66 = arith.cmpi eq, %arg1, %c1_i32 : i32
    %67 = arith.extui %66 : i1 to i32
    %c0_i32_34 = arith.constant 0 : i32
    %68 = arith.cmpi ne, %67, %c0_i32_34 : i32
    scf.if %68 {
      %c0_35 = arith.constant 0 : index
      %c0_36 = arith.constant 0 : index
      %69 = vector.load %arg12[%c0_35, %c0_36] : memref<1x1xf32, #tpu.memory_space<vmem>>, vector<1x1xf32>
      %70 = vector.shape_cast %69 : vector<1x1xf32> to vector<1x1x1xf32>
      %c0_37 = arith.constant 0 : index
      %c0_38 = arith.constant 0 : index
      %c0_39 = arith.constant 0 : index
      %71 = vector.load %arg10[%c0_37, %c0_38, %c0_39] : memref<1x1x1xf32, #tpu.memory_space<vmem>>, vector<1x1x1xf32>
      tpu.vector_store %arg10[%c0_37, %c0_38, %c0_39], %70 {strides = array<i32>} : memref<1x1x1xf32, #tpu.memory_space<vmem>>, vector<1x1x1xf32>,
      %c0_40 = arith.constant 0 : index
      %c0_41 = arith.constant 0 : index
      %72 = vector.load %arg13[%c0_40, %c0_41] : memref<1x256xf32, #tpu.memory_space<vmem>>, vector<1x256xf32>
      %73 = vector.shape_cast %72 : vector<1x256xf32> to vector<1x1x256xf32>
      %c0_42 = arith.constant 0 : index
      %c0_43 = arith.constant 0 : index
      %c0_44 = arith.constant 0 : index
      %74 = vector.load %arg11[%c0_42, %c0_43, %c0_44] : memref<1x1x256xf32, #tpu.memory_space<vmem>>, vector<1x1x256xf32>
      tpu.vector_store %arg11[%c0_42, %c0_43, %c0_44], %73 {strides = array<i32>} : memref<1x1x256xf32, #tpu.memory_space<vmem>>, vector<1x1x256xf32>,
    } else {
    }
    return
  }
  func.func @transform_0(%arg0: i32, %arg1: i32) -> (i32, i32) {
    %c2_i32 = arith.constant 2 : i32
    %0 = arith.muli %arg1, %c2_i32 : i32
    %1 = arith.addi %0, %arg0 : i32
    %c0_i32 = arith.constant 0 : i32
    %c0_i32_0 = arith.constant 0 : i32
    return %1, %c0_i32 : i32, i32
  }
  func.func @transform_1(%arg0: i32, %arg1: i32) -> (i32, i32) {
    %c0_i32 = arith.constant 0 : i32
    %c0_i32_0 = arith.constant 0 : i32
    %c0_i32_1 = arith.constant 0 : i32
    return %c0_i32, %c0_i32_0 : i32, i32
  }
  func.func @transform_2(%arg0: i32, %arg1: i32) -> (i32, i32) {
    %c0_i32 = arith.constant 0 : i32
    %c0_i32_0 = arith.constant 0 : i32
    %c0_i32_1 = arith.constant 0 : i32
    return %c0_i32, %c0_i32_0 : i32, i32
  }
  func.func @transform_3(%arg0: i32, %arg1: i32) -> (i32, i32) {
    %c0_i32 = arith.constant 0 : i32
    %c0_i32_0 = arith.constant 0 : i32
    %c0_i32_1 = arith.constant 0 : i32
    return %c0_i32, %c0_i32_0 : i32, i32
  }
  func.func @transform_4(%arg0: i32, %arg1: i32) -> (i32, i32) {
    %c0_i32 = arith.constant 0 : i32
    %c0_i32_0 = arith.constant 0 : i32
    %c0_i32_1 = arith.constant 0 : i32
    return %c0_i32, %c0_i32_0 : i32, i32
  }
  func.func @transform_5(%arg0: i32, %arg1: i32) -> (i32, i32) {
    %c0_i32 = arith.constant 0 : i32
    %c0_i32_0 = arith.constant 0 : i32
    %c0_i32_1 = arith.constant 0 : i32
    return %c0_i32, %c0_i32_0 : i32, i32
  }
  func.func @transform_6(%arg0: i32, %arg1: i32) -> (i32, i32) {
    %c2_i32 = arith.constant 2 : i32
    %0 = arith.muli %arg1, %c2_i32 : i32
    %1 = arith.addi %0, %arg0 : i32
    %c0_i32 = arith.constant 0 : i32
    %c0_i32_0 = arith.constant 0 : i32
    return %1, %c0_i32 : i32, i32
  }
  func.func @transform_7(%arg0: i32, %arg1: i32) -> (i32, i32, i32) {
    %c2_i32 = arith.constant 2 : i32
    %0 = arith.muli %arg1, %c2_i32 : i32
    %1 = arith.addi %0, %arg0 : i32
    %c0_i32 = arith.constant 0 : i32
    %c0_i32_0 = arith.constant 0 : i32
    %c0_i32_1 = arith.constant 0 : i32
    return %1, %c0_i32, %c0_i32_0 : i32, i32, i32
  }
  func.func @transform_8(%arg0: i32, %arg1: i32) -> (i32, i32, i32) {
    %c0_i32 = arith.constant 0 : i32
    %c0_i32_0 = arith.constant 0 : i32
    %c0_i32_1 = arith.constant 0 : i32
    return %arg0, %c0_i32, %c0_i32_0 : i32, i32, i32
  }
  func.func @transform_9(%arg0: i32, %arg1: i32) -> (i32, i32, i32) {
    %c0_i32 = arith.constant 0 : i32
    %c0_i32_0 = arith.constant 0 : i32
    %c0_i32_1 = arith.constant 0 : i32
    return %arg0, %c0_i32, %c0_i32_0 : i32, i32, i32
  }
}

</mosaic_0001>

<bundles_post_ra>
// kernel: vqgan_quantize.1
= control target key start
LH: loop header
LB: loop body
LE: loop exit
PB: predicated region body
PF: predicated region fallthrough
CT: control target
= control target key end

     0   :  { %s2478_s30 = smov 0   ;;  %s2480_s10 = smov 0   ;;  %s3887_s0 = inlined_call_operand.vmem [shape: f32[512,128], index: 0, kind: input, shape index: {}]   ;;  %s3888_s1 = inlined_call_operand.vmem [shape: f32[128,32], index: 1, kind: input, shape index: {}]   ;;  %s3889_s2 = inlined_call_operand.vmem [shape: f32[1,32], index: 2, kind: input, shape index: {}]   ;;  %s3890_s3 = inlined_call_operand.vmem [shape: f32[32,256], index: 3, kind: input, shape index: {}]   ;;  %s3891_s4 = inlined_call_operand.vmem [shape: f32[256,128], index: 4, kind: input, shape index: {}]   ;;  %s3892_s5 = inlined_call_operand.vmem [shape: f32[1,128], index: 5, kind: input, shape index: {}]   ;;  %s3893_s6 = inlined_call_operand.vmem [shape: f32[512,128], index: 6, kind: output, shape index: {0}]   ;;  %s3894_s7 = inlined_call_operand.vmem [shape: s32[4,1,128], index: 7, kind: output, shape index: {1}]   ;;  %s3895_s8 = inlined_call_operand.vmem [shape: f32[2,1,1], index: 8, kind: output, shape index: {2}]   ;;  %s3896_s9 = inlined_call_operand.vmem [shape: f32[2,1,256], index: 9, kind: output, shape index: {3}]  }
   0x1   :  { %s2482_s11 = smov 0   ;;  %s2484_s12 = smov 0  }
   0x2   :  { %s2486_s13 = smov 0  }
   0x3 LB: > { %s29_s14 = sadd.s32 1, %s2414_s11  ;;  %s32_s15 = sadd.s32 1, %s2418_s12  ;;  %s2422_s13 = sphi %s2486_s13, %s20_s13   ;;  %s2418_s12 = sphi %s2484_s12, %s3930_s12   ;;  %s2414_s11 = sphi %s2482_s11, %s3929_s11   ;;  %s2410_s10 = sphi %s2480_s10, %s3928_s10   ;;  %s2406_s30 = sphi %s2478_s30, %s3927_s30  }
   0x4   : > { %p30_p0 = scmp.ge.s32.totalorder %s29_s14, 2  ;;  %p1976_p1 = scmp.ge.s32.totalorder %s2422_s13, 1 }
   0x5   : > { %p323_p2 = scmp.lt.s32.totalorder %s2422_s13, 5 }
   0x6   : > { %s3932_s14 = smov (%p30_p0, %s29_s14), 0  ;;  %s3934_s15 = smov (!%p30_p0, %s32_s15), %s2418_s12 }
   0x7   : > { %p324_p3 = pnand %p1976_p1, %p323_p2  ;;  %p34_p4 = scmp.ge.s32.totalorder %s3934_s15, 2 }
   0x8   : > { %s1977_s16 = sshll.u32 (!%p324_p3), %s2406_s30, 1  ;;  %p402_p7 = scmp.lt.s32.totalorder (!%p324_p3), %s2410_s10, 1 }
   0x9   : > { %s3936_s15 = smov (%p34_p4, %s3934_s15), 0  ;;  %327 = sbr.rel (%p324_p3) target bundleno = 1272 (0x4f8), region = 44 }
   0xa   : > { %3908 = sst [smem:[#allocation4_spill]] %s3936_s15  ;;  %s2511_s17 = sadd.s32 (!%p324_p3), %s2410_s10, %s1977_s16 }
   0xb   : > { %s1978_s18 = sshll.u32 (!%p324_p3), %s2511_s17, 4  ;;  %p397_p5 = scmp.lt.s32.totalorder (!%p324_p3), %s2511_s17, 3 }
   0xc   : > { %p378_p6 = scmp.lt.s32.totalorder (!%p324_p3), %s1978_s18, 63  ;;  %p1985_p8 = scmp.ne.s32.totalorder (!%p324_p3), %s2406_s30, 0 }
   0xe   : > { %s2516_s19 = scalar_select %p397_p5, %s2511_s17, 3 }
   0xf   : > { %s3938_s18 = smov (!%p378_p6, %s1978_s18), 63  ;;  %s3940_s10 = smov (!%p402_p7, %s2410_s10), 1 }
  0x10   : > { %s1979_s23 = sshll.u32 %s3938_s18, 3  ;;  %s404_s20 = scalar_lea.vmem %s3895_s8, %s3940_s10 }
  0x11   : > { %s2525_s26 = scalar_lea.vmem %s3887_s0, %s1979_s23  ;;  %s2530_s29 = scalar_lea.vmem %s3893_s6, %s1979_s23 }
  0x12   : > { %s1984_s21 = sshll.u32 %s3940_s10, 1  ;;  %412 = sbr.rel (%p1985_p8) target bundleno = 27 (0x1b), region = 48 }
  0x13   : > { %s2542_s24 = scalar_lea.vmem %s3896_s9, %s1984_s21 }
  0x17   : > { %vm413_vm0 = vcmask 0   ;;  %v415_v0 = vlaneseq  ;;  %v2424_v1 = vmov 0.0  }
  0x18   : > { %414 = vst.msk [vmem:[#allocation2] sm:$0x1] %vm413_vm0, %v2424_v1 }
  0x19   : > { %vm417_vm1 = vcmp.lt.s32.totalorder %v415_v0, 256 }
  0x1a   : > { %419 = vst.msk [vmem:[#allocation3] sm:$0x3] %vm417_vm1, %v2424_v1 }
  0x1b PF: > { %v454_v2 = vld [vmem:[%s3888_s1 + $0x78] sm:$0xff]  ;;  %v453_v3 = vld [vmem:[%s3888_s1 + $0x70] sm:$0xff]  ;;  %v452_v4 = vld [vmem:[%s3888_s1 + $0x68] sm:$0xff]  ;;  %vm623_vm2 = vcmask 261120   ;;  %s3922_s18 = scalar_lea.vmem %s3894_s7, %s2516_s19  ;;  %p2086_p9 = scmp.ne.s32.totalorder %s2406_s30, 1 }
  0x1c   : > { %2201 = vmatprep.subr.mxu0 %v454_v2  ;;  %v451_v5 = vld [vmem:[%s3888_s1 + $0x60] sm:$0xff]  ;;  %v450_v7 = vld [vmem:[%s3888_s1 + $0x58] sm:$0xff]  ;;  %v449_v8 = vld [vmem:[%s3888_s1 + $0x50] sm:$0xff] }
  0x1d   : > { %2202 = vmatpush3.msra.mxu0 %v454_v2  ;;  %v423_v6 = vld [vmem:[%s2525_s26] sm:$0xff]  ;;  %v448_v9 = vld [vmem:[%s3888_s1 + $0x48] sm:$0xff]  ;;  %v446_v11 = vld [vmem:[%s3888_s1 + $0x38] sm:$0xff] }
  0x1e   : > { %2203 = vmatprep.subr.mxu0 %v453_v3  ;;  %2233 = vmatprep.mubr.f32.mxu0 %v423_v6  ;;  %v447_v10 = vld [vmem:[%s3888_s1 + $0x40] sm:$0xff]  ;;  %v445_v12 = vld [vmem:[%s3888_s1 + $0x30] sm:$0xff]  ;;  %v444_v13 = vld [vmem:[%s3888_s1 + $0x28] sm:$0xff] }
  0x1f   : > { %2204 = vmatpush3.msra.mxu0 %v453_v3  ;;  %v443_v14 = vld [vmem:[%s3888_s1 + $0x20] sm:$0xff]  ;;  %v442_v15 = vld [vmem:[%s3888_s1 + $0x18] sm:$0xff]  ;;  %v441_v16 = vld [vmem:[%s3888_s1 + $0x10] sm:$0xff] }
  0x20   : > { %2205 = vmatprep.subr.mxu0 %v452_v4  ;;  %v440_v17 = vld [vmem:[%s3888_s1 + $0x8] sm:$0xff]  ;;  %v439_v18 = vld [vmem:[%s3888_s1] sm:$0xff]  ;;  %v425_v20 = vld [vmem:[%s2525_s26 + $0x10] sm:$0xff] }
  0x21   : > { %2206 = vmatpush3.msra.mxu0 %v452_v4  ;;  %v424_v19 = vld [vmem:[%s2525_s26 + $0x8] sm:$0xff]  ;;  %v426_v21 = vld [vmem:[%s2525_s26 + $0x18] sm:$0xff]  ;;  %v427_v22 = vld [vmem:[%s2525_s26 + $0x20] sm:$0xff] }
  0x22   : > { %2207 = vmatprep.subr.mxu0 %v451_v5  ;;  %v428_v23 = vld [vmem:[%s2525_s26 + $0x28] sm:$0xff]  ;;  %v429_v24 = vld [vmem:[%s2525_s26 + $0x30] sm:$0xff]  ;;  %v430_v25 = vld [vmem:[%s2525_s26 + $0x38] sm:$0xff] }
  0x23   : > { %2208 = vmatpush3.msra.mxu0 %v451_v5  ;;  %v431_v26 = vld [vmem:[%s2525_s26 + $0x40] sm:$0xff]  ;;  %v432_v27 = vld [vmem:[%s2525_s26 + $0x48] sm:$0xff]  ;;  %v433_v28 = vld [vmem:[%s2525_s26 + $0x50] sm:$0xff] }
  0x24   : > { %2209 = vmatprep.subr.mxu0 %v450_v7  ;;  %v434_v29 = vld [vmem:[%s2525_s26 + $0x58] sm:$0xff]  ;;  %v435_v30 = vld [vmem:[%s2525_s26 + $0x60] sm:$0xff]  ;;  %v436_v31 = vld [vmem:[%s2525_s26 + $0x68] sm:$0xff] }
  0x25   : > { %2210 = vmatpush3.msra.mxu0 %v450_v7  ;;  %v437_v32 = vld [vmem:[%s2525_s26 + $0x70] sm:$0xff]  ;;  %v438_v33 = vld [vmem:[%s2525_s26 + $0x78] sm:$0xff]  ;;  %v2612_v35 = vld [vmem:[%s3889_s2] ss:$0 sm:$0xff]  ;;  %s1987_s26 = sshll.u32 %s2511_s17, 7 }
  0x26   : > { %2211 = vmatprep.subr.mxu0 %v449_v8 }
  0x27   : > { %2212 = vmatpush3.msra.mxu0 %v449_v8 }
  0x28   : > { %2213 = vmatprep.subr.mxu0 %v448_v9 }
  0x29   : > { %2214 = vmatpush3.msra.mxu0 %v448_v9 }
  0x2a   : > { %2215 = vmatprep.subr.mxu0 %v447_v10 }
  0x2b   : > { %2216 = vmatpush3.msra.mxu0 %v447_v10 }
  0x2c   : > { %2217 = vmatprep.subr.mxu0 %v446_v11 }
  0x2d   : > { %2218 = vmatpush3.msra.mxu0 %v446_v11 }
  0x2e   : > { %2219 = vmatprep.subr.mxu0 %v445_v12 }
  0x2f   : > { %2220 = vmatpush3.msra.mxu0 %v445_v12 }
  0x30   : > { %2221 = vmatprep.subr.mxu0 %v444_v13 }
  0x31   : > { %2222 = vmatpush3.msra.mxu0 %v444_v13 }
  0x32   : > { %2223 = vmatprep.subr.mxu0 %v443_v14 }
  0x33   : > { %2224 = vmatpush3.msra.mxu0 %v443_v14 }
  0x34   : > { %2225 = vmatprep.subr.mxu0 %v442_v15 }
  0x35   : > { %2226 = vmatpush3.msra.mxu0 %v442_v15 }
  0x36   : > { %2227 = vmatprep.subr.mxu0 %v441_v16 }
  0x37   : > { %2228 = vmatpush3.msra.mxu0 %v441_v16 }
  0x38   : > { %2229 = vmatprep.subr.mxu0 %v440_v17 }
  0x39   : > { %2230 = vmatpush3.msra.mxu0 %v440_v17 }
  0x3a   : > { %2231 = vmatprep.subr.mxu0 %v439_v18 }
  0x3b   : > { %2232 = vmatpush3.msra.mxu0 %v439_v18 }
  0x3c   : > { %2234 = vmatmul.mubr.f32.vlgmr.msra.gmra.mxu0 %v424_v19 }
  0x3d   : > { %2236 = vmatprep.mubr.f32.mxu0 %v425_v20 }
  0x40   : > { %2237 = vmatmul.mubr.f32.gmra.mxu0 %v426_v21 }
  0x41   : > { %2239 = vmatprep.mubr.f32.mxu0 %v427_v22 }
  0x44   : > { %2240 = vmatmul.mubr.f32.gmra.mxu0 %v428_v23  ;;  %v727_v23 = vld [vmem:[%s3890_s3 + $0x38] sm:$0xff] }
  0x45   : > { %2242 = vmatprep.mubr.f32.mxu0 %v429_v24  ;;  %800 = vmatprep.subr.mxu1 %v727_v23 }
  0x48   : > { %2243 = vmatmul.mubr.f32.gmra.mxu0 %v430_v25 }
  0x49   : > { %2245 = vmatprep.mubr.f32.mxu0 %v431_v26 }
  0x4c   : > { %2246 = vmatmul.mubr.f32.gmra.mxu0 %v432_v27 }
  0x4d   : > { %2248 = vmatprep.mubr.f32.mxu0 %v433_v28  ;;  %v726_v28 = vld [vmem:[%s3890_s3 + $0x30] sm:$0xff] }
  0x4e   : > { %801 = vmatpush1.msra.mxu1 %v726_v28 }
  0x50   : > { %2249 = vmatmul.mubr.f32.gmra.mxu0 %v434_v29 }
  0x51   : > { %2251 = vmatprep.mubr.f32.mxu0 %v435_v30  ;;  %v725_v30 = vld [vmem:[%s3890_s3 + $0x28] sm:$0xff] }
  0x52   : > { %802 = vmatprep.subr.mxu1 %v725_v30 }
  0x54   : > { %2252 = vmatmul.mubr.f32.gmra.mxu0 %v436_v31 }
  0x55   : > { %2254 = vmatprep.mubr.f32.mxu0 %v437_v32 }
  0x58   : > { %2255 = vmatmul.mubr.f32.gmra.mxu0 %v438_v33  ;;  %v724_v33 = vld [vmem:[%s3890_s3 + $0x20] sm:$0xff] }
  0x59   : > { %803 = vmatpush1.msra.mxu1 %v724_v33 }
  0xfc   : > { %v2235_v34 = vpop.f32.mrf.mxu0 }
  0xfd   : > { %v2615_v37 = vadd.f32 %v2235_v34, %v2612_v35  ;;  %v723_v34 = vld [vmem:[%s3890_s3 + $0x18] sm:$0xff] }
  0xfe   : > { %v528_v36 = vpop.f32.mrf.mxu0  ;;  %804 = vmatprep.subr.mxu1 %v723_v34 }
  0xff   : > { %v2618_v38 = vadd.f32 %v2612_v35, %v528_v36  ;;  %v608_v45 = vmul.f32 %v2615_v37, %v2615_v37 }
 0x100   : > { %v2238_v39 = vpop.f32.mrf.mxu0 }
 0x101   : > { %v607_v40 = vmul.f32 %v2618_v38, %v2618_v38  ;;  %v2623_v42 = vadd.f32 %v2238_v39, %v2612_v35  ;;  %v627_v52 = vsel %vm623_vm2, %v608_v45, 0.0  ;;  %v720_v45 = vld [vmem:[%s3890_s3] sm:$0xff] }
 0x102   : > { %v538_v41 = vpop.f32.mrf.mxu0 }
 0x103   : > { %v2626_v43 = vadd.f32 %v2612_v35, %v538_v41  ;;  %v624_v44 = vsel %vm623_vm2, %v607_v40, 0.0  ;;  %v610_v53 = vmul.f32 %v2623_v42, %v2623_v42  ;;  %v722_v40 = vld [vmem:[%s3890_s3 + $0x10] sm:$0xff]  ;;  %v721_v41 = vld [vmem:[%s3890_s3 + $0x8] sm:$0xff] }
 0x104   : > { %v2241_v46 = vpop.f32.mrf.mxu0  ;;  %625 = vadd.xlane.f32.xlu0 %v624_v44  ;;  %805 = vmatpush1.msra.mxu1 %v722_v40 }
 0x105   : > { %v2632_v47 = vadd.f32 %v2241_v46, %v2612_v35  ;;  %v609_v48 = vmul.f32 %v2626_v43, %v2626_v43  ;;  %v633_v60 = vsel %vm623_vm2, %v610_v53, 0.0  ;;  %806 = vmatprep.subr.mxu1 %v721_v41 }
 0x106   : > { %v548_v49 = vpop.f32.mrf.mxu0  ;;  %807 = vmatpush1.msra.mxu1 %v720_v45 }
 0x107   : > { %v2637_v50 = vadd.f32 %v2612_v35, %v548_v49  ;;  %v630_v51 = vsel %vm623_vm2, %v609_v48, 0.0  ;;  %v612_v57 = vmul.f32 %v2632_v47, %v2632_v47  ;;  %v2425_v48 = vmov 0.0  }
 0x108   : > { %v2244_v54 = vpop.f32.mrf.mxu0  ;;  %631 = vadd.xlane.f32.xlu1 %v630_v51  ;;  %628 = vadd.xlane.f32.xlu0 %v627_v52 }
 0x109   : > { %v2644_v55 = vadd.f32 %v2244_v54, %v2612_v35  ;;  %v611_v56 = vmul.f32 %v2637_v50, %v2637_v50  ;;  %v639_v0 = vsel %vm623_vm2, %v612_v57, 0.0  ;;  %840 = vmatprep.mubr.f32.mxu1 %v2425_v48 }
 0x10a   : > { %v558_v58 = vpop.f32.mrf.mxu0 }
 0x10b   : > { %v2651_v59 = vadd.f32 %v2612_v35, %v558_v58  ;;  %v636_v61 = vsel %vm623_vm2, %v611_v56, 0.0  ;;  %v614_v2 = vmul.f32 %v2644_v55, %v2644_v55 }
 0x10c   : > { %v2247_v62 = vpop.f32.mrf.mxu0  ;;  %634 = vadd.xlane.f32.xlu1 %v633_v60  ;;  %637 = vadd.xlane.f32.xlu0 %v636_v61 }
 0x10d   : > { %v2656_v63 = vadd.f32 %v2247_v62, %v2612_v35  ;;  %v613_v1 = vmul.f32 %v2651_v59, %v2651_v59  ;;  %v645_v8 = vsel %vm623_vm2, %v614_v2, 0.0 }
 0x10e   : > { %v568_v3 = vpop.f32.mrf.mxu0 }
 0x10f   : > { %v2664_v4 = vadd.f32 %v2612_v35, %v568_v3  ;;  %v642_v5 = vsel %vm623_vm2, %v613_v1, 0.0  ;;  %v616_v10 = vmul.f32 %v2656_v63, %v2656_v63 }
 0x110   : > { %v2250_v6 = vpop.f32.mrf.mxu0  ;;  %640 = vadd.xlane.f32.xlu1 %v639_v0  ;;  %643 = vadd.xlane.f32.xlu0 %v642_v5 }
 0x111   : > { %v2668_v7 = vadd.f32 %v2250_v6, %v2612_v35  ;;  %v615_v9 = vmul.f32 %v2664_v4, %v2664_v4  ;;  %v651_v16 = vsel %vm623_vm2, %v616_v10, 0.0 }
 0x112   : > { %v578_v11 = vpop.f32.mrf.mxu0 }
 0x113   : > { %v2676_v12 = vadd.f32 %v2612_v35, %v578_v11  ;;  %v648_v13 = vsel %vm623_vm2, %v615_v9, 0.0  ;;  %v618_v18 = vmul.f32 %v2668_v7, %v2668_v7 }
 0x114   : > { %v2253_v14 = vpop.f32.mrf.mxu0  ;;  %646 = vadd.xlane.f32.xlu1 %v645_v8  ;;  %649 = vadd.xlane.f32.xlu0 %v648_v13 }
 0x115   : > { %v2680_v15 = vadd.f32 %v2253_v14, %v2612_v35  ;;  %v617_v17 = vmul.f32 %v2676_v12, %v2676_v12  ;;  %v657_v25 = vsel %vm623_vm2, %v618_v18, 0.0 }
 0x116   : > { %v588_v19 = vpop.f32.mrf.mxu0 }
 0x117   : > { %v2688_v20 = vadd.f32 %v2612_v35, %v588_v19  ;;  %v654_v21 = vsel %vm623_vm2, %v617_v17, 0.0  ;;  %v620_v27 = vmul.f32 %v2680_v15, %v2680_v15 }
 0x118   : > { %v2256_v22 = vpop.f32.mrf.mxu0  ;;  %652 = vadd.xlane.f32.xlu1 %v651_v16  ;;  %655 = vadd.xlane.f32.xlu0 %v654_v21 }
 0x119   : > { %v2695_v24 = vadd.f32 %v2256_v22, %v2612_v35  ;;  %v619_v26 = vmul.f32 %v2688_v20, %v2688_v20  ;;  %v663_v36 = vsel %vm623_vm2, %v620_v27, 0.0 }
 0x11a   : > { %v598_v29 = vpop.f32.mrf.mxu0 }
 0x11b   : > { %v2709_v31 = vadd.f32 %v2612_v35, %v598_v29  ;;  %v660_v32 = vsel %vm623_vm2, %v619_v26, 0.0  ;;  %v622_v35 = vmul.f32 %v2695_v24, %v2695_v24 }
 0x11c   : > { %658 = vadd.xlane.f32.xlu1 %v657_v25  ;;  %661 = vadd.xlane.f32.xlu0 %v660_v32 }
 0x11d   : > { %v621_v39 = vmul.f32 %v2709_v31, %v2709_v31  ;;  %v669_v46 = vsel %vm623_vm2, %v622_v35, 0.0 }
 0x11f   : > { %v666_v44 = vsel %vm623_vm2, %v621_v39, 0.0 }
 0x120   : > { %664 = vadd.xlane.f32.xlu1 %v663_v36  ;;  %667 = vadd.xlane.f32.xlu0 %v666_v44 }
 0x124   : > { %670 = vadd.xlane.f32.xlu1 %v669_v46 }
 0x18d   : > { %v626_v49 = vpop.xlane.xlu0 %625 }
 0x18e   : > { %v672_v51 = vmax.f32 %v626_v49, 1e-12 }
 0x190   : > { %2352 = vrsqrt.f32 %v672_v51 }
 0x191   : > { %v632_v52 = vpop.xlane.xlu1 %631  ;;  %v629_v53 = vpop.xlane.xlu0 %628 }
 0x192   : > { %v673_v54 = vmax.f32 %v629_v53, 1e-12  ;;  %v674_v56 = vmax.f32 %v632_v52, 1e-12 }
 0x194   : > { %2354 = vrsqrt.f32 %v673_v54 }
 0x195   : > { %v635_v57 = vpop.xlane.xlu1 %634  ;;  %2356 = vrsqrt.f32 %v674_v56  ;;  %v638_v60 = vpop.xlane.xlu0 %637 }
 0x196   : > { %v675_v58 = vmax.f32 %v635_v57, 1e-12  ;;  %v676_v61 = vmax.f32 %v638_v60, 1e-12 }
 0x198   : > { %2358 = vrsqrt.f32 %v675_v58 }
 0x199   : > { %v641_v62 = vpop.xlane.xlu1 %640  ;;  %2360 = vrsqrt.f32 %v676_v61  ;;  %v644_v3 = vpop.xlane.xlu0 %643 }
 0x19a   : > { %v677_v2 = vmax.f32 %v641_v62, 1e-12  ;;  %v678_v6 = vmax.f32 %v644_v3, 1e-12 }
 0x19c   : > { %2362 = vrsqrt.f32 %v677_v2 }
 0x19d   : > { %v2353_v0 = vpop.eup %2352  ;;  %v647_v10 = vpop.xlane.xlu1 %646  ;;  %2364 = vrsqrt.f32 %v678_v6 }
 0x19e   : > { %v704_v1 = vmul.f32 %v2353_v0, %v2618_v38  ;;  %v679_v38 = vmax.f32 %v647_v10, 1e-12  ;;  %v650_v14 = vpop.xlane.xlu0 %649 }
 0x19f   : > { %v680_v16 = vmax.f32 %v650_v14, 1e-12 }
 0x1a0   : > { %1989 = vmatmul.mubr.msk.f32.vlgmr.msra.gmra.mxu1 %vm623_vm2, %v704_v1  ;;  %2366 = vrsqrt.f32 %v679_v38 }
 0x1a1   : > { %846 = vmatprep.mubr.f32.mxu1 %v2425_v48  ;;  %v2355_v5 = vpop.eup %2354  ;;  %v653_v18 = vpop.xlane.xlu1 %652  ;;  %2368 = vrsqrt.f32 %v680_v16 }
 0x1a2   : > { %v705_v8 = vmul.f32 %v2355_v5, %v2615_v37  ;;  %v2357_v9 = vpop.eup %2356  ;;  %v681_v19 = vmax.f32 %v653_v18, 1e-12  ;;  %v656_v22 = vpop.xlane.xlu0 %655 }
 0x1a3   : > { %v706_v11 = vmul.f32 %v2357_v9, %v2626_v43  ;;  %v682_v23 = vmax.f32 %v656_v22, 1e-12 }
 0x1a4   : > { %1990 = vmatmul.mubr.msk.f32.gmra.mxu1 %vm623_vm2, %v705_v8  ;;  %2370 = vrsqrt.f32 %v681_v19 }
 0x1a5   : > { %852 = vmatprep.mubr.f32.mxu1 %v2425_v48  ;;  %v2359_v13 = vpop.eup %2358  ;;  %v659_v26 = vpop.xlane.xlu1 %658  ;;  %2372 = vrsqrt.f32 %v682_v23 }
 0x1a6   : > { %v707_v37 = vmul.f32 %v2359_v13, %v2623_v42  ;;  %v2361_v17 = vpop.eup %2360  ;;  %v683_v27 = vmax.f32 %v659_v26, 1e-12  ;;  %v662_v29 = vpop.xlane.xlu0 %661 }
 0x1a7   : > { %v708_v43 = vmul.f32 %v2361_v17, %v2637_v50  ;;  %v684_v30 = vmax.f32 %v662_v29, 1e-12 }
 0x1a8   : > { %1991 = vmatmul.mubr.msk.f32.gmra.mxu1 %vm623_vm2, %v706_v11  ;;  %2374 = vrsqrt.f32 %v683_v27 }
 0x1a9   : > { %858 = vmatprep.mubr.f32.mxu1 %v2425_v48  ;;  %v2363_v21 = vpop.eup %2362  ;;  %v665_v33 = vpop.xlane.xlu1 %664  ;;  %2376 = vrsqrt.f32 %v684_v30 }
 0x1aa   : > { %v709_v42 = vmul.f32 %v2363_v21, %v2632_v47  ;;  %v2365_v25 = vpop.eup %2364  ;;  %v685_v34 = vmax.f32 %v665_v33, 1e-12  ;;  %v668_v39 = vpop.xlane.xlu0 %667 }
 0x1ab   : > { %v710_v50 = vmul.f32 %v2365_v25, %v2651_v59  ;;  %v686_v35 = vmax.f32 %v668_v39, 1e-12 }
 0x1ac   : > { %1992 = vmatmul.mubr.msk.f32.gmra.mxu1 %vm623_vm2, %v707_v37  ;;  %2378 = vrsqrt.f32 %v685_v34 }
 0x1ad   : > { %864 = vmatprep.mubr.f32.mxu1 %v2425_v48  ;;  %v2367_v28 = vpop.eup %2366  ;;  %v671_v41 = vpop.xlane.xlu1 %670  ;;  %2380 = vrsqrt.f32 %v686_v35 }
 0x1ae   : > { %v711_v47 = vmul.f32 %v2367_v28, %v2644_v55  ;;  %v2369_v32 = vpop.eup %2368  ;;  %v687_v44 = vmax.f32 %v671_v41, 1e-12 }
 0x1af   : > { %v712_v59 = vmul.f32 %v2369_v32, %v2664_v4 }
 0x1b0   : > { %1993 = vmatmul.mubr.msk.f32.gmra.mxu1 %vm623_vm2, %v708_v43  ;;  %2382 = vrsqrt.f32 %v687_v44 }
 0x1b1   : > { %870 = vmatprep.mubr.f32.mxu1 %v2425_v48  ;;  %v2371_v36 = vpop.eup %2370 }
 0x1b2   : > { %v713_v55 = vmul.f32 %v2371_v36, %v2656_v63  ;;  %v2373_v40 = vpop.eup %2372 }
 0x1b3   : > { %v714_v4 = vmul.f32 %v2373_v40, %v2676_v12 }
 0x1b4   : > { %1994 = vmatmul.mubr.msk.f32.gmra.mxu1 %vm623_vm2, %v709_v42 }
 0x1b5   : > { %876 = vmatprep.mubr.f32.mxu1 %v2425_v48  ;;  %v2375_v45 = vpop.eup %2374 }
 0x1b6   : > { %v715_v46 = vmul.f32 %v2375_v45, %v2668_v7  ;;  %v2377_v49 = vpop.eup %2376 }
 0x1b7   : > { %v716_v63 = vmul.f32 %v2377_v49, %v2688_v20 }
 0x1b8   : > { %1995 = vmatmul.mubr.msk.f32.gmra.mxu1 %vm623_vm2, %v710_v50 }
 0x1b9   : > { %882 = vmatprep.mubr.f32.mxu1 %v2425_v48  ;;  %v2379_v51 = vpop.eup %2378 }
 0x1ba   : > { %v717_v12 = vmul.f32 %v2379_v51, %v2680_v15  ;;  %v2381_v52 = vpop.eup %2380 }
 0x1bb   : > { %v718_v7 = vmul.f32 %v2381_v52, %v2709_v31 }
 0x1bc   : > { %1996 = vmatmul.mubr.msk.f32.gmra.mxu1 %vm623_vm2, %v711_v47 }
 0x1bd   : > { %888 = vmatprep.mubr.f32.mxu1 %v2425_v48  ;;  %v2383_v53 = vpop.eup %2382 }
 0x1be   : > { %v719_v20 = vmul.f32 %v2383_v53, %v2695_v24 }
 0x1c0   : > { %1997 = vmatmul.mubr.msk.f32.gmra.mxu1 %vm623_vm2, %v712_v59 }
 0x1c1   : > { %894 = vmatprep.mubr.f32.mxu1 %v2425_v48 }
 0x1c4   : > { %1998 = vmatmul.mubr.msk.f32.gmra.mxu1 %vm623_vm2, %v713_v55 }
 0x1c5   : > { %900 = vmatprep.mubr.f32.mxu1 %v2425_v48 }
 0x1c8   : > { %1999 = vmatmul.mubr.msk.f32.gmra.mxu1 %vm623_vm2, %v714_v4 }
 0x1c9   : > { %906 = vmatprep.mubr.f32.mxu1 %v2425_v48 }
 0x1cc   : > { %2000 = vmatmul.mubr.msk.f32.gmra.mxu1 %vm623_vm2, %v715_v46 }
 0x1cd   : > { %912 = vmatprep.mubr.f32.mxu1 %v2425_v48 }
 0x1d0   : > { %2001 = vmatmul.mubr.msk.f32.gmra.mxu1 %vm623_vm2, %v716_v63 }
 0x1d1   : > { %918 = vmatprep.mubr.f32.mxu1 %v2425_v48 }
 0x1d4   : > { %2002 = vmatmul.mubr.msk.f32.gmra.mxu1 %vm623_vm2, %v717_v12 }
 0x1d5   : > { %924 = vmatprep.mubr.f32.mxu1 %v2425_v48 }
 0x1d8   : > { %2003 = vmatmul.mubr.msk.f32.gmra.mxu1 %vm623_vm2, %v718_v7 }
 0x1d9   : > { %930 = vmatprep.mubr.f32.mxu1 %v2425_v48 }
 0x1dc   : > { %2004 = vmatmul.mubr.msk.f32.gmra.mxu1 %vm623_vm2, %v719_v20 }
 0x260   : > { %v2782_v54 = vpop.f32.mrf.mxu1 }
 0x262   : > { %v2784_v56 = vpop.f32.mrf.mxu1 }
 0x263   : > { %vm940_vm3 = vcmp.ge.f32.partialorder %v2782_v54, %v2784_v56  ;;  %v1356_v15 = vmax.f32 %v2782_v54, %v2784_v56 }
 0x264   : > { %v941_v31 = vsel %vm940_vm3, %v2782_v54, %v2784_v56  ;;  %v2795_v57 = vpop.f32.mrf.mxu1 }
 0x265   : > { %943 = vmax.index.xlane.f32.xlu0 %v941_v31  ;;  %v1628_v31 = vld [vmem:[%s3891_s4 + $0xf8] sm:$0xff] }
 0x266   : > { %v2797_v24 = vpop.f32.mrf.mxu1  ;;  %2121 = vmatprep.subr.mxu0 %v1628_v31  ;;  %2257 = vmatprep.subr.mxu1 %v1628_v31  ;;  %v1620_v31 = vld [vmem:[%s3891_s4 + $0xb8] sm:$0xff] }
 0x267   : > { %vm948_vm4 = vcmp.ge.f32.partialorder %v2795_v57, %v2797_v24  ;;  %v1359_v58 = vmax.f32 %v2795_v57, %v2797_v24 }
 0x268   : > { %v2803_v60 = vpop.f32.mrf.mxu1  ;;  %v949_v61 = vsel %vm948_vm4, %v2795_v57, %v2797_v24 }
 0x269   : > { %951 = vmax.index.xlane.f32.xlu0 %v949_v61  ;;  %v1612_v61 = vld [vmem:[%s3891_s4 + $0x78] sm:$0xff] }
 0x26a   : > { %v2810_v62 = vpop.f32.mrf.mxu1  ;;  %2122 = vmatpush3.msra.mxu0 %v1612_v61  ;;  %2273 = vmatpush3.msra.mxu1 %v1612_v61  ;;  %v1604_v61 = vld [vmem:[%s3891_s4 + $0x38] sm:$0xff] }
 0x26b   : > { %vm956_vm5 = vcmp.ge.f32.partialorder %v2803_v60, %v2810_v62  ;;  %v1362_v0 = vmax.f32 %v2803_v60, %v2810_v62 }
 0x26c   : > { %v2816_v1 = vpop.f32.mrf.mxu1  ;;  %v957_v2 = vsel %vm956_vm5, %v2803_v60, %v2810_v62 }
 0x26d   : > { %959 = vmax.index.xlane.f32.xlu1 %v957_v2  ;;  %v1627_v2 = vld [vmem:[%s3891_s4 + $0xf0] sm:$0xff] }
 0x26e   : > { %v2823_v3 = vpop.f32.mrf.mxu1  ;;  %2123 = vmatprep.subr.mxu0 %v1627_v2  ;;  %2258 = vmatprep.subr.mxu1 %v1627_v2  ;;  %v1619_v2 = vld [vmem:[%s3891_s4 + $0xb0] sm:$0xff] }
 0x26f   : > { %vm964_vm6 = vcmp.ge.f32.partialorder %v2816_v1, %v2823_v3  ;;  %v1365_v5 = vmax.f32 %v2816_v1, %v2823_v3 }
 0x270   : > { %v2829_v6 = vpop.f32.mrf.mxu1  ;;  %v965_v8 = vsel %vm964_vm6, %v2816_v1, %v2823_v3 }
 0x271   : > { %967 = vmax.index.xlane.f32.xlu1 %v965_v8  ;;  %v1611_v8 = vld [vmem:[%s3891_s4 + $0x70] sm:$0xff] }
 0x272   : > { %v2836_v9 = vpop.f32.mrf.mxu1  ;;  %2124 = vmatpush3.msra.mxu0 %v1611_v8  ;;  %2274 = vmatpush3.msra.mxu1 %v1611_v8  ;;  %v1603_v8 = vld [vmem:[%s3891_s4 + $0x30] sm:$0xff] }
 0x273   : > { %vm972_vm7 = vcmp.ge.f32.partialorder %v2829_v6, %v2836_v9  ;;  %v1368_v10 = vmax.f32 %v2829_v6, %v2836_v9 }
 0x274   : > { %v2842_v38 = vpop.f32.mrf.mxu1  ;;  %v973_v11 = vsel %vm972_vm7, %v2829_v6, %v2836_v9 }
 0x275   : > { %975 = vmax.index.xlane.f32.xlu0 %v973_v11  ;;  %v1626_v11 = vld [vmem:[%s3891_s4 + $0xe8] sm:$0xff] }
 0x276   : > { %v2849_v13 = vpop.f32.mrf.mxu1  ;;  %2125 = vmatprep.subr.mxu0 %v1626_v11  ;;  %2259 = vmatprep.subr.mxu1 %v1626_v11  ;;  %v1618_v11 = vld [vmem:[%s3891_s4 + $0xa8] sm:$0xff] }
 0x277   : > { %vm980_vm8 = vcmp.ge.f32.partialorder %v2842_v38, %v2849_v13  ;;  %v1371_v14 = vmax.f32 %v2842_v38, %v2849_v13 }
 0x278   : > { %v2855_v16 = vpop.f32.mrf.mxu1  ;;  %v981_v37 = vsel %vm980_vm8, %v2842_v38, %v2849_v13 }
 0x279   : > { %983 = vmax.index.xlane.f32.xlu1 %v981_v37  ;;  %v1610_v37 = vld [vmem:[%s3891_s4 + $0x68] sm:$0xff] }
 0x27a   : > { %v2862_v17 = vpop.f32.mrf.mxu1  ;;  %2126 = vmatpush3.msra.mxu0 %v1610_v37  ;;  %2275 = vmatpush3.msra.mxu1 %v1610_v37  ;;  %v1602_v37 = vld [vmem:[%s3891_s4 + $0x28] sm:$0xff] }
 0x27b   : > { %vm988_vm9 = vcmp.ge.f32.partialorder %v2855_v16, %v2862_v17  ;;  %v1374_v18 = vmax.f32 %v2855_v16, %v2862_v17 }
 0x27c   : > { %v2868_v19 = vpop.f32.mrf.mxu1  ;;  %v989_v43 = vsel %vm988_vm9, %v2855_v16, %v2862_v17 }
 0x27d   : > { %991 = vmax.index.xlane.f32.xlu1 %v989_v43  ;;  %v1625_v43 = vld [vmem:[%s3891_s4 + $0xe0] sm:$0xff] }
 0x27e   : > { %v2875_v21 = vpop.f32.mrf.mxu1  ;;  %2127 = vmatprep.subr.mxu0 %v1625_v43  ;;  %2260 = vmatprep.subr.mxu1 %v1625_v43  ;;  %v1617_v43 = vld [vmem:[%s3891_s4 + $0xa0] sm:$0xff] }
 0x27f   : > { %vm996_vm10 = vcmp.ge.f32.partialorder %v2868_v19, %v2875_v21  ;;  %v1377_v22 = vmax.f32 %v2868_v19, %v2875_v21 }
 0x280   : > { %v2881_v23 = vpop.f32.mrf.mxu1  ;;  %v997_v42 = vsel %vm996_vm10, %v2868_v19, %v2875_v21 }
 0x281   : > { %999 = vmax.index.xlane.f32.xlu0 %v997_v42  ;;  %v1609_v42 = vld [vmem:[%s3891_s4 + $0x60] sm:$0xff] }
 0x282   : > { %v2888_v25 = vpop.f32.mrf.mxu1  ;;  %2128 = vmatpush3.msra.mxu0 %v1609_v42  ;;  %2276 = vmatpush3.msra.mxu1 %v1609_v42  ;;  %v3907_v42 = vlaneseq }
 0x283   : > { %v1380_v26 = vmax.f32 %v2881_v23, %v2888_v25  ;;  %vm1004_vm12 = vcmp.ge.f32.partialorder %v2881_v23, %v2888_v25 }
 0x284   : > { %v2892_v27 = vpop.f32.mrf.mxu1  ;;  %v1005_v34 = vsel %vm1004_vm12, %v2881_v23, %v2888_v25  ;;  %v3194_v3 = vshrl.u32 %v3907_v42, 7 }
 0x286   : > { %v2894_v50 = vpop.f32.mrf.mxu1  ;;  %v1278_v23 = vadd.s32 24, %v3194_v3  ;;  %v1277_v25 = vadd.s32 16, %v3194_v3 }
 0x287   : > { %vm1012_vm11 = vcmp.ge.f32.partialorder %v2892_v27, %v2894_v50  ;;  %v1383_v28 = vmax.f32 %v2892_v27, %v2894_v50 }
 0x288   : > { %v2900_v29 = vpop.f32.mrf.mxu1  ;;  %v1013_v30 = vsel %vm1012_vm11, %v2892_v27, %v2894_v50 }
 0x289   : > { %1015 = vmax.index.xlane.f32.xlu1 %v1013_v30  ;;  %v1624_v30 = vld [vmem:[%s3891_s4 + $0xd8] sm:$0xff] }
 0x28a   : > { %v2909_v47 = vpop.f32.mrf.mxu1  ;;  %2129 = vmatprep.subr.mxu0 %v1624_v30  ;;  %2261 = vmatprep.subr.mxu1 %v1624_v30  ;;  %v1601_v30 = vld [vmem:[%s3891_s4 + $0x20] sm:$0xff] }
 0x28b   : > { %vm1020_vm13 = vcmp.ge.f32.partialorder %v2900_v29, %v2909_v47  ;;  %v1386_v32 = vmax.f32 %v2900_v29, %v2909_v47 }
 0x28c   : > { %v2915_v33 = vpop.f32.mrf.mxu1  ;;  %v1021_v59 = vsel %vm1020_vm13, %v2900_v29, %v2909_v47  ;;  %v1280_v47 = vadd.s32 40, %v3194_v3 }
 0x28d   : > { %1007 = vmax.index.xlane.f32.xlu1 %v1005_v34  ;;  %1023 = vmax.index.xlane.f32.xlu0 %v1021_v59  ;;  %v1608_v34 = vld [vmem:[%s3891_s4 + $0x58] sm:$0xff]  ;;  %v1623_v59 = vld [vmem:[%s3891_s4 + $0xd0] sm:$0xff] }
 0x28e   : > { %v2927_v36 = vpop.f32.mrf.mxu1  ;;  %2130 = vmatpush3.msra.mxu0 %v1608_v34  ;;  %2277 = vmatpush3.msra.mxu1 %v1608_v34  ;;  %v1616_v34 = vld [vmem:[%s3891_s4 + $0x98] sm:$0xff] }
 0x28f   : > { %vm1028_vm14 = vcmp.ge.f32.partialorder %v2915_v33, %v2927_v36  ;;  %v1389_v39 = vmax.f32 %v2915_v33, %v2927_v36  ;;  %2131 = vmatprep.subr.mxu0 %v1623_v59  ;;  %2262 = vmatprep.subr.mxu1 %v1623_v59  ;;  %v1600_v59 = vld [vmem:[%s3891_s4 + $0x18] sm:$0xff] }
 0x290   : > { %v2933_v35 = vpop.f32.mrf.mxu1  ;;  %v1029_v55 = vsel %vm1028_vm14, %v2915_v33, %v2927_v36 }
 0x291   : > { %1031 = vmax.index.xlane.f32.xlu0 %v1029_v55  ;;  %v1607_v55 = vld [vmem:[%s3891_s4 + $0x50] sm:$0xff] }
 0x292   : > { %v2940_v40 = vpop.f32.mrf.mxu1  ;;  %2132 = vmatpush3.msra.mxu0 %v1607_v55  ;;  %2278 = vmatpush3.msra.mxu1 %v1607_v55  ;;  %v1615_v55 = vld [vmem:[%s3891_s4 + $0x90] sm:$0xff] }
 0x293   : > { %vm1036_vm15 = vcmp.ge.f32.partialorder %v2933_v35, %v2940_v40  ;;  %v1392_v41 = vmax.f32 %v2933_v35, %v2940_v40 }
 0x294   : > { %v2946_v44 = vpop.f32.mrf.mxu1  ;;  %v1037_v4 = vsel %vm1036_vm15, %v2933_v35, %v2940_v40 }
 0x295   : > { %1039 = vmax.index.xlane.f32.xlu0 %v1037_v4  ;;  %v1622_v4 = vld [vmem:[%s3891_s4 + $0xc8] sm:$0xff] }
 0x296   : > { %v2953_v45 = vpop.f32.mrf.mxu1  ;;  %2133 = vmatprep.subr.mxu0 %v1622_v4  ;;  %2263 = vmatprep.subr.mxu1 %v1622_v4  ;;  %v3070_v4 = vand.u32 127, %v3907_v42 }
 0x297   : > { %vm1044_vm0 = vcmp.ge.f32.partialorder %v2946_v44, %v2953_v45  ;;  %v1395_v46 = vmax.f32 %v2946_v44, %v2953_v45 }
 0x298   : > { %v2959_v49 = vpop.f32.mrf.mxu1  ;;  %v1045_v63 = vsel %vm1044_vm0, %v2946_v44, %v2953_v45  ;;  %v1070_v13 = vsub.s32 %v3070_v4, %v3194_v3  ;;  %v1079_v27 = vadd.s32 4294967280, %v3070_v4 }
 0x299   : > { %1047 = vmax.index.xlane.f32.xlu1 %v1045_v63  ;;  %v1606_v63 = vld [vmem:[%s3891_s4 + $0x48] sm:$0xff] }
 0x29a   : > { %v2966_v51 = vpop.f32.mrf.mxu1  ;;  %2134 = vmatpush3.msra.mxu0 %v1606_v63  ;;  %2279 = vmatpush3.msra.mxu1 %v1606_v63  ;;  %v1599_v63 = vld [vmem:[%s3891_s4 + $0x10] sm:$0xff]  ;;  %v1082_v56 = vsub.s32 %v1079_v27, %v3194_v3 }
 0x29b   : > { %vm1052_vm1 = vcmp.ge.f32.partialorder %v2959_v49, %v2966_v51  ;;  %v1398_v12 = vmax.f32 %v2959_v49, %v2966_v51 }
 0x29c   : > { %v2972_v52 = vpop.f32.mrf.mxu1  ;;  %v1053_v7 = vsel %vm1052_vm1, %v2959_v49, %v2966_v51  ;;  %v1282_v49 = vadd.s32 56, %v3194_v3  ;;  %v1284_v51 = vadd.s32 72, %v3194_v3 }
 0x29d   : > { %1055 = vmax.index.xlane.f32.xlu0 %v1053_v7  ;;  %v1621_v7 = vld [vmem:[%s3891_s4 + $0xc0] sm:$0xff] }
 0x29e   : > { %v2979_v53 = vpop.f32.mrf.mxu1  ;;  %2135 = vmatprep.subr.mxu0 %v1621_v7  ;;  %2264 = vmatprep.subr.mxu1 %v1621_v7  ;;  %v1614_v7 = vld [vmem:[%s3891_s4 + $0x88] sm:$0xff] }
 0x29f   : > { %vm1060_vm2 = vcmp.ge.f32.partialorder %v2972_v52, %v2979_v53  ;;  %v1401_v1 = vmax.f32 %v2972_v52, %v2979_v53 }
 0x2a0   : > { %v1061_v20 = vsel %vm1060_vm2, %v2972_v52, %v2979_v53  ;;  %v3381_v52 = vadd.s32 4294967264, %v3070_v4  ;;  %v3384_v53 = vadd.s32 4294967256, %v3070_v4 }
 0x2a1   : > { %1063 = vmax.index.xlane.f32.xlu0 %v1061_v20  ;;  %v1605_v20 = vld [vmem:[%s3891_s4 + $0x40] sm:$0xff] }
 0x2a2   : > { %2136 = vmatpush3.msra.mxu0 %v1605_v20  ;;  %2280 = vmatpush3.msra.mxu1 %v1605_v20  ;;  %v1598_v20 = vld [vmem:[%s3891_s4 + $0x8] sm:$0xff] }
 0x2a3   : > { %2137 = vmatprep.subr.mxu0 %v1620_v31  ;;  %2265 = vmatprep.subr.mxu1 %v1620_v31 }
 0x2a4   : > { %2138 = vmatpush3.msra.mxu0 %v1604_v61  ;;  %2281 = vmatpush3.msra.mxu1 %v1604_v61  ;;  %v3082_v61 = vadd.s32 128, %v3070_v4 }
 0x2a5   : > { %2139 = vmatprep.subr.mxu0 %v1619_v2  ;;  %2266 = vmatprep.subr.mxu1 %v1619_v2  ;;  %v1613_v2 = vld [vmem:[%s3891_s4 + $0x80] sm:$0xff] }
 0x2a6   : > { %2140 = vmatpush3.msra.mxu0 %v1603_v8  ;;  %2282 = vmatpush3.msra.mxu1 %v1603_v8  ;;  %v1597_v8 = vld [vmem:[%s3891_s4] sm:$0xff]  ;;  %v1046_v57 = vsel %vm1044_vm0, %v3070_v4, %v3082_v61  ;;  %v1054_v24 = vsel %vm1052_vm1, %v3070_v4, %v3082_v61 }
 0x2a7   : > { %2141 = vmatprep.subr.mxu0 %v1618_v11  ;;  %2267 = vmatprep.subr.mxu1 %v1618_v11  ;;  %v942_v11 = vsel %vm940_vm3, %v3070_v4, %v3082_v61 }
 0x2a8   : > { %2142 = vmatpush3.msra.mxu0 %v1602_v37  ;;  %2283 = vmatpush3.msra.mxu1 %v1602_v37 }
 0x2a9   : > { %2143 = vmatprep.subr.mxu0 %v1617_v43  ;;  %2268 = vmatprep.subr.mxu1 %v1617_v43 }
 0x2aa   : > { %2144 = vmatpush3.msra.mxu0 %v1601_v30  ;;  %2284 = vmatpush3.msra.mxu1 %v1601_v30  ;;  %v950_v30 = vsel %vm948_vm4, %v3070_v4, %v3082_v61 }
 0x2ab   : > { %2145 = vmatprep.subr.mxu0 %v1616_v34  ;;  %2269 = vmatprep.subr.mxu1 %v1616_v34 }
 0x2ac   : > { %2146 = vmatpush3.msra.mxu0 %v1600_v59  ;;  %2285 = vmatpush3.msra.mxu1 %v1600_v59  ;;  %v966_v59 = vsel %vm964_vm6, %v3070_v4, %v3082_v61 }
 0x2ad   : > { %2147 = vmatprep.subr.mxu0 %v1615_v55  ;;  %2270 = vmatprep.subr.mxu1 %v1615_v55  ;;  %v958_v55 = vsel %vm956_vm5, %v3070_v4, %v3082_v61  ;;  %vm1077_vm5 = vcmask 130112  }
 0x2ae   : > { %2148 = vmatpush3.msra.mxu0 %v1599_v63  ;;  %2286 = vmatpush3.msra.mxu1 %v1599_v63 }
 0x2af   : > { %2149 = vmatprep.subr.mxu0 %v1614_v7  ;;  %2271 = vmatprep.subr.mxu1 %v1614_v7 }
 0x2b0   : > { %2150 = vmatpush3.msra.mxu0 %v1598_v20  ;;  %2287 = vmatpush3.msra.mxu1 %v1598_v20  ;;  %v982_v20 = vsel %vm980_vm8, %v3070_v4, %v3082_v61  ;;  %vm1084_vm8 = vcmask 195712  }
 0x2b1   : > { %2151 = vmatprep.subr.mxu0 %v1613_v2  ;;  %2272 = vmatprep.subr.mxu1 %v1613_v2 }
 0x2b2   : > { %2152 = vmatpush3.msra.mxu0 %v1597_v8  ;;  %2288 = vmatpush3.msra.mxu1 %v1597_v8  ;;  %v990_v8 = vsel %vm988_vm9, %v3070_v4, %v3082_v61  ;;  %vm1091_vm9 = vcmask 261312  }
 0x2ee   : > { %v944_v31 = vpop.xlane.xlu0 %943 }
 0x2ef   : > { %2335 = vset.pattern.permute.xlu1 %v944_v31  ;;  %v974_v31 = vsel %vm972_vm7, %v3070_v4, %v3082_v61 }
 0x2f2   : > { %v952_v37 = vpop.xlane.xlu0 %951 }
 0x2f3   : > { %946 = vperm.xlu1 %2335, %v942_v11   ;;  %2336 = vset.pattern.permute.xlu0 %v952_v37 }
 0x2f6   : > { %v960_v43 = vpop.xlane.xlu1 %959 }
 0x2f7   : > { %954 = vperm.xlu0 %2336, %v950_v30   ;;  %v1014_v30 = vsel %vm1012_vm11, %v3070_v4, %v3082_v61 }
 0x2fa   : > { %v968_v34 = vpop.xlane.xlu1 %967 }
 0x2fb   : > { %2338 = vset.pattern.permute.xlu1 %v968_v34  ;;  %2337 = vset.pattern.permute.xlu0 %v960_v43  ;;  %v998_v34 = vsel %vm996_vm10, %v3070_v4, %v3082_v61 }
 0x2fe   : > { %v976_v63 = vpop.xlane.xlu0 %975 }
 0x2ff   : > { %970 = vperm.xlu1 %2338, %v966_v59   ;;  %962 = vperm.xlu0 %2337, %v958_v55  }
 0x302   : > { %v984_v7 = vpop.xlane.xlu1 %983 }
 0x303   : > { %2340 = vset.pattern.permute.xlu0 %v984_v7  ;;  %2339 = vset.pattern.permute.xlu1 %v976_v63  ;;  %v1006_v63 = vsel %vm1004_vm12, %v3070_v4, %v3082_v61 }
 0x306   : > { %v992_v2 = vpop.xlane.xlu1 %991 }
 0x307   : > { %986 = vperm.xlu0 %2340, %v982_v20   ;;  %978 = vperm.xlu1 %2339, %v974_v31   ;;  %v1022_v31 = vsel %vm1020_vm13, %v3070_v4, %v3082_v61 }
 0x30a   : > { %v1000_v11 = vpop.xlane.xlu0 %999 }
 0x30b   : > { %2341 = vset.pattern.permute.xlu1 %v992_v2 }
 0x30f   : > { %994 = vperm.xlu1 %2341, %v990_v8   ;;  %v1030_v8 = vsel %vm1028_vm14, %v3070_v4, %v3082_v61 }
 0x312   : > { %v1016_v37 = vpop.xlane.xlu1 %1015 }
 0x313   : > { %2344 = vset.pattern.permute.xlu0 %v1016_v37  ;;  %2342 = vset.pattern.permute.xlu1 %v1000_v11  ;;  %v1038_v11 = vsel %vm1036_vm15, %v3070_v4, %v3082_v61 }
 0x316   : > { %v1024_v43 = vpop.xlane.xlu0 %1023  ;;  %v1008_v59 = vpop.xlane.xlu1 %1007 }
 0x317   : > { %1018 = vperm.xlu0 %2344, %v1014_v30   ;;  %1002 = vperm.xlu1 %2342, %v998_v34   ;;  %v3396_v30 = vadd.s32 4294967248, %v3070_v4 }
 0x31a   : > { %v1032_v55 = vpop.xlane.xlu0 %1031 }
 0x31b   : > { %2343 = vset.pattern.permute.xlu1 %v1008_v59 }
 0x31e   : > { %v1040_v7 = vpop.xlane.xlu0 %1039 }
 0x31f   : > { %1010 = vperm.xlu1 %2343, %v1006_v63  }
 0x322   : > { %v1048_v37 = vpop.xlane.xlu1 %1047 }
 0x323   : > { %2345 = vset.pattern.permute.xlu1 %v1024_v43 }
 0x326   : > { %v1056_v20 = vpop.xlane.xlu0 %1055 }
 0x327   : > { %1026 = vperm.xlu1 %2345, %v1022_v31   ;;  %v1103_v31 = vsub.s32 %v3384_v53, %v3194_v3 }
 0x32a   : > { %v1064_v2 = vpop.xlane.xlu0 %1063 }
 0x32b   : > { %2346 = vset.pattern.permute.xlu1 %v1032_v55  ;;  %2351 = vset.pattern.permute.xlu0 %v1064_v2  ;;  %v1283_v55 = vadd.s32 64, %v3194_v3 }
 0x32f   : > { %1034 = vperm.xlu1 %2346, %v1030_v8  }
 0x333   : > { %2347 = vset.pattern.permute.xlu1 %v1040_v7 }
 0x336   : > { %1360 = vmax.xlane.f32.xlu0 %v1359_v58  ;;  %v1062_v58 = vsel %vm1060_vm2, %v3070_v4, %v3082_v61 }
 0x337   : > { %1042 = vperm.xlu1 %2347, %v1038_v11   ;;  %v3424_v11 = vadd.s32 4294967240, %v3070_v4 }
 0x33a   : > { %1366 = vmax.xlane.f32.xlu0 %v1365_v5  ;;  %v1072_v5 = vadd.s32 4294967288, %v3070_v4 }
 0x33b   : > { %2348 = vset.pattern.permute.xlu1 %v1048_v37  ;;  %v3427_v37 = vadd.s32 4294967224, %v3070_v4 }
 0x33c   : > { %v1075_v19 = vsub.s32 %v1072_v5, %v3194_v3 }
 0x33e   : > { %1372 = vmax.xlane.f32.xlu0 %v1371_v14  ;;  %v2426_v14 = vmov 1.0  }
 0x33f   : > { %1050 = vperm.xlu1 %2348, %v1046_v57   ;;  %v1285_v57 = vadd.s32 80, %v3194_v3 }
 0x342   : > { %1378 = vmax.xlane.f32.xlu0 %v1377_v22  ;;  %v1086_v22 = vadd.s32 4294967272, %v3070_v4 }
 0x343   : > { %2349 = vset.pattern.permute.xlu1 %v1056_v20  ;;  %v1096_v20 = vsub.s32 %v3381_v52, %v3194_v3 }
 0x344   : > { %v1089_v54 = vsub.s32 %v1086_v22, %v3194_v3  ;;  %v1286_v22 = vadd.s32 88, %v3194_v3 }
 0x346   : > { %1384 = vmax.xlane.f32.xlu0 %v1383_v28 }
 0x347   : > { %1058 = vperm.xlu1 %2349, %v1054_v24   ;;  %v1110_v24 = vsub.s32 %v3396_v30, %v3194_v3 }
 0x34a   : > { %1390 = vmax.xlane.f32.xlu0 %v1389_v39 }
 0x34b   : > { %2350 = vset.pattern.permute.xlu1 %v1064_v2 }
 0x34e   : > { %1396 = vmax.xlane.f32.xlu0 %v1395_v46 }
 0x34f   : > { %1066 = vperm.xlu1 %2350, %v1062_v58  }
 0x352   : > { %1402 = vmax.xlane.f32.xlu0 %v1401_v1 }
 0x36e   : > { %v3197_v38 = vpop.permute.xlu1 %946 }
 0x36f   : > { %vm1178_vm3 = vcmp.eq.s32.totalorder %v3070_v4, %v3197_v38  ;;  %vm1179_vm4 = vcmp.eq.s32.totalorder %v3082_v61, %v3197_v38  ;;  %v1071_v50 = vrot.slane %v3197_v38, %v1070_v13  ;;  %v3440_v13 = vadd.s32 4294967232, %v3070_v4 }
 0x370   : > { %2054 = vmatprep.mubr.msk.f32.mxu0 %vm1179_vm4, %v2426_v14  ;;  %v3509_v38 = vadd.s32 4294967208, %v3070_v4 }
 0x371   : > { %2055 = vmatmul.mubr.msk.f32.vlgmr.msra.gmra.mxu0 %vm1178_vm3, %v2426_v14 }
 0x372   : > { %v3214_v21 = vpop.permute.xlu0 %954 }
 0x373   : > { %v1076_v28 = vrot.slane %v3214_v21, %v1075_v19  ;;  %1357 = vmax.xlane.f32.xlu1 %v1356_v15  ;;  %vm1181_vm6 = vcmp.eq.s32.totalorder %v3082_v61, %v3214_v21  ;;  %vm1180_vm7 = vcmp.eq.s32.totalorder %v3070_v4, %v3214_v21 }
 0x374   : > { %2056 = vmatprep.mubr.msk.f32.mxu0 %vm1181_vm6, %v2426_v14 }
 0x375   : > { %v1078_v33 = vsel %vm1077_vm5, %v1076_v28, %v1071_v50  ;;  %2057 = vmatmul.mubr.msk.f32.gmra.mxu0 %vm1180_vm7, %v2426_v14  ;;  %v1287_v50 = vadd.s32 96, %v3194_v3  ;;  %v2007_v28 = vsel %vm1180_vm7, 1.0, %v2425_v48 }
 0x377   : > { %1363 = vmax.xlane.f32.xlu1 %v1362_v0 }
 0x37a   : > { %v3240_v15 = vpop.permute.xlu1 %970  ;;  %v3242_v36 = vpop.permute.xlu0 %962 }
 0x37b   : > { %v1090_v39 = vrot.slane %v3240_v15, %v1089_v54  ;;  %v1083_v44 = vrot.slane %v3242_v36, %v1082_v56  ;;  %1369 = vmax.xlane.f32.xlu1 %v1368_v10  ;;  %vm1183_vm10 = vcmp.eq.s32.totalorder %v3082_v61, %v3242_v36  ;;  %vm1182_vm11 = vcmp.eq.s32.totalorder %v3070_v4, %v3242_v36 }
 0x37c   : > { %2058 = vmatprep.mubr.msk.f32.mxu0 %vm1183_vm10, %v2426_v14  ;;  %vm1185_vm12 = vcmp.eq.s32.totalorder %v3082_v61, %v3240_v15  ;;  %vm1184_vm13 = vcmp.eq.s32.totalorder %v3070_v4, %v3240_v15  ;;  %v1276_v10 = vadd.s32 8, %v3194_v3  ;;  %v1131_v54 = vsub.s32 %v3427_v37, %v3194_v3 }
 0x37d   : > { %v1085_v60 = vsel %vm1084_vm8, %v1083_v44, %v1078_v33  ;;  %2059 = vmatmul.mubr.msk.f32.gmra.mxu0 %vm1182_vm11, %v2426_v14  ;;  %v1117_v33 = vsub.s32 %v3424_v11, %v3194_v3  ;;  %v2009_v21 = vsel %vm1182_vm11, 1.0, %v2425_v48  ;;  %v1145_v15 = vsub.s32 %v3509_v38, %v3194_v3 }
 0x37e   : > { %2060 = vmatprep.mubr.msk.f32.mxu0 %vm1185_vm12, %v2426_v14  ;;  %v3267_v62 = vsel %vm1091_vm9, %v1090_v39, %v1085_v60  ;;  %v2008_v39 = vsel %vm1181_vm6, 1.0, %v2425_v48 }
 0x37f   : > { %1375 = vmax.xlane.f32.xlu1 %v1374_v18  ;;  %v3338_v18 = vstv %s1987_s26 }
 0x380   : > { %v1292_v29 = vadd.s32 %v3338_v18, %v3194_v3  ;;  %v1295_v35 = vadd.s32 %v3338_v18, %v1278_v23  ;;  %v1294_v40 = vadd.s32 %v3338_v18, %v1277_v25  ;;  %v1297_v46 = vadd.s32 %v3338_v18, %v1280_v47 }
 0x381   : > { %2061 = vmatmul.mubr.msk.f32.gmra.mxu0 %vm1184_vm13, %v2426_v14  ;;  %v1299_v63 = vadd.s32 %v3338_v18, %v1282_v49  ;;  %v1301_v7 = vadd.s32 %v3338_v18, %v1284_v51  ;;  %v1300_v5 = vadd.s32 %v3338_v18, %v1283_v55  ;;  %v1302_v56 = vadd.s32 %v3338_v18, %v1285_v57 }
 0x382   : > { %v3278_v0 = vpop.permute.xlu1 %978  ;;  %v3280_v6 = vpop.permute.xlu0 %986  ;;  %v1124_v23 = vsub.s32 %v3440_v13, %v3194_v3  ;;  %v1303_v25 = vadd.s32 %v3338_v18, %v1286_v22  ;;  %v1290_v13 = vadd.s32 120, %v3194_v3 }
 0x383   : > { %1381 = vmax.xlane.f32.xlu1 %v1380_v26  ;;  %vm3906_vm14 = vcmp.eq.s32.totalorder %v3082_v61, %v3278_v0  ;;  %vm1186_vm15 = vcmp.eq.s32.totalorder %v3070_v4, %v3278_v0  ;;  %vm3904_vm0 = vcmp.eq.s32.totalorder %v3082_v61, %v3280_v6  ;;  %vm3903_vm1 = vcmp.eq.s32.totalorder %v3070_v4, %v3280_v6 }
 0x384   : > { %2062 = vmatprep.mubr.msk.f32.mxu0 %vm3906_vm14, %v2426_v14  ;;  %v1293_v26 = vadd.s32 %v3338_v18, %v1276_v10  ;;  %vm1316_vm7 = vcmp.lt.s32.totalorder %v1300_v5, 288  ;;  %v2005_v10 = vsel %vm1178_vm3, 1.0, %v2425_v48  ;;  %vm1318_vm3 = vcmp.lt.s32.totalorder %v1302_v56, 288 }
 0x385   : > { %2063 = vmatmul.mubr.msk.f32.gmra.mxu0 %vm1186_vm15, %v2426_v14  ;;  %v2013_v57 = vsel %vm1186_vm15, 1.0, %v2425_v48  ;;  %v3538_v5 = vadd.s32 4294967192, %v3070_v4  ;;  %vm1112_vm15 = vcmask 458112   ;;  %v1097_v42 = vrot.slane %v3278_v0, %v1096_v20 }
 0x386   : > { %2064 = vmatprep.mubr.msk.f32.mxu0 %vm3904_vm0, %v2426_v14  ;;  %vm1310_vm0 = vcmp.lt.s32.totalorder %v1294_v40, 288 }
 0x387   : > { %1387 = vmax.xlane.f32.xlu1 %v1386_v32  ;;  %v1279_v32 = vadd.s32 32, %v3194_v3  ;;  %v3421_v8 = vsel %vm1310_vm0, 1.0, %v2425_v48  ;;  %vm1315_vm0 = vcmp.lt.s32.totalorder %v1299_v63, 288 }
 0x388   : > { %v3475_v44 = vsel %vm1315_vm0, 1.0, %v2425_v48  ;;  %v1503_v49 = vmul.f32 %v3421_v8, %v2009_v21  ;;  %vm3910_vm0 = vcmp.eq.s32.totalorder %v3082_v61, %v3280_v6 }
 0x389   : > { %2065 = vmatmul.mubr.msk.f32.gmra.mxu0 %vm3903_vm1, %v2426_v14  ;;  %vm1311_vm1 = vcmp.lt.s32.totalorder %v1295_v35, 288  ;;  %v3502_v35 = vadd.s32 4294967216, %v3070_v4 }
 0x38a   : > { %v3312_v9 = vpop.permute.xlu1 %994  ;;  %v3418_v2 = vsel %vm1311_vm1, 1.0, %v2425_v48  ;;  %vm1317_vm1 = vcmp.lt.s32.totalorder %v1301_v7, 288  ;;  %v2011_v7 = vsel %vm1184_vm13, 1.0, %v2425_v48  ;;  %vm1098_vm13 = vcmask 326912  }
 0x38b   : > { %1393 = vmax.xlane.f32.xlu1 %v1392_v41  ;;  %vm3897_vm2 = vcmp.eq.s32.totalorder %v3082_v61, %v3312_v9  ;;  %vm3898_vm5 = vcmp.eq.s32.totalorder %v3070_v4, %v3312_v9  ;;  %v1281_v41 = vadd.s32 48, %v3194_v3  ;;  %v3478_v60 = vsel %vm1317_vm1, 1.0, %v2425_v48 }
 0x38c   : > { %2066 = vmatprep.mubr.msk.f32.mxu0 %vm3897_vm2, %v2426_v14  ;;  %v1138_v21 = vsub.s32 %v3502_v35, %v3194_v3  ;;  %vm3911_vm1 = vcmp.eq.s32.totalorder %v3070_v4, %v3280_v6 }
 0x38d   : > { %2067 = vmatmul.mubr.msk.f32.gmra.mxu0 %vm3898_vm5, %v2426_v14  ;;  %v1298_v43 = vadd.s32 %v3338_v18, %v1281_v41  ;;  %v3506_v41 = vsel %vm1316_vm7, 1.0, %v2425_v48  ;;  %vm3912_vm7 = vcmp.eq.s32.totalorder %v3070_v4, %v3312_v9 }
 0x38f   : > { %1399 = vmax.xlane.f32.xlu1 %v1398_v12  ;;  %v1296_v12 = vadd.s32 %v3338_v18, %v1279_v32  ;;  %v1304_v32 = vadd.s32 %v3338_v18, %v1287_v50  ;;  %v2012_v50 = vsel %vm1185_vm12, 1.0, %v2425_v48  ;;  %vm1105_vm12 = vcmask 392512  }
 0x391   : > { %vm1312_vm14 = vcmp.lt.s32.totalorder %v1296_v12, 288  ;;  %v3517_v12 = vadd.s32 4294967200, %v3070_v4  ;;  %vm1320_vm11 = vcmp.lt.s32.totalorder %v1304_v32, 288  ;;  %v2015_v32 = vsel %vm3911_vm1, 1.0, %v2425_v48 }
 0x392   : > { %v3334_v16 = vpop.permute.xlu1 %1002  ;;  %v3336_v17 = vpop.permute.xlu0 %1018  ;;  %v3436_v1 = vsel %vm1312_vm14, 1.0, %v2425_v48  ;;  %vm3909_vm14 = vcmp.eq.s32.totalorder %v3082_v61, %v3278_v0 }
 0x393   : > { %vm3901_vm8 = vcmp.eq.s32.totalorder %v3070_v4, %v3336_v17  ;;  %vm3900_vm9 = vcmp.eq.s32.totalorder %v3082_v61, %v3334_v16  ;;  %vm3899_vm2 = vcmp.eq.s32.totalorder %v3082_v61, %v3336_v17  ;;  %vm3902_vm5 = vcmp.eq.s32.totalorder %v3070_v4, %v3334_v16 }
 0x394   : > { %2068 = vmatprep.mubr.msk.f32.mxu0 %vm3900_vm9, %v2426_v14  ;;  %2072 = vmatprep.mubr.msk.f32.mxu1 %vm3899_vm2, %v2426_v14  ;;  %vm1309_vm2 = vcmp.lt.s32.totalorder %v1293_v26, 288  ;;  %vm1308_vm9 = vcmp.lt.s32.totalorder %v1292_v29, 288  ;;  %v2006_v26 = vsel %vm1179_vm4, 1.0, %v2425_v48  ;;  %v2010_v29 = vsel %vm1183_vm10, 1.0, %v2425_v48 }
 0x395   : > { %2069 = vmatmul.mubr.msk.f32.gmra.mxu0 %vm3902_vm5, %v2426_v14  ;;  %2073 = vmatmul.mubr.msk.f32.vlgmr.msra.gmra.mxu1 %vm3901_vm8, %v2426_v14  ;;  %v3404_v34 = vsel %vm1309_vm2, 1.0, %v2425_v48  ;;  %v3408_v59 = vsel %vm1308_vm9, 1.0, %v2425_v48  ;;  %vm1314_vm2 = vcmp.lt.s32.totalorder %v1298_v43, 288  ;;  %vm1319_vm4 = vcmp.lt.s32.totalorder %v1303_v25, 288 }
 0x396   : > { %v3450_v27 = vsel %vm1314_vm2, 1.0, %v2425_v48  ;;  %v1501_v47 = vmul.f32 %v3404_v34, %v2007_v28  ;;  %v1502_v40 = vmul.f32 %v3404_v34, %v2008_v39  ;;  %v1499_v36 = vmul.f32 %v3408_v59, %v2005_v10 }
 0x397   : > { %v1500_v43 = vmul.f32 %v3408_v59, %v2006_v26  ;;  %v1504_v55 = vmul.f32 %v3421_v8, %v2010_v29  ;;  %v2014_v28 = vsel %vm3909_vm14, 1.0, %v2425_v48  ;;  %v3559_v29 = vsel %vm1318_vm3, 1.0, %v2425_v48 }
 0x398   : > { %v1531_v63 = vadd.f32 %v1501_v47, %v1499_v36  ;;  %v1507_v36 = vmul.f32 %v3436_v1, %v2013_v57  ;;  %v1508_v56 = vmul.f32 %v3436_v1, %v2014_v28  ;;  %v2016_v57 = vsel %vm3910_vm0, 1.0, %v2425_v48 }
 0x399   : > { %v1552_v22 = vadd.f32 %v1502_v40, %v1500_v43  ;;  %v1505_v40 = vmul.f32 %v3418_v2, %v2011_v7  ;;  %v1506_v43 = vmul.f32 %v3418_v2, %v2012_v50  ;;  %v1289_v7 = vadd.s32 112, %v3194_v3 }
 0x39a   : > { %v3374_v45 = vpop.permute.xlu1 %1010  ;;  %v1532_v10 = vadd.f32 %v1531_v63, %v1503_v49  ;;  %v3578_v63 = vadd.s32 4294967184, %v3070_v4  ;;  %vm1119_vm3 = vcmask 523712   ;;  %vm3914_vm1 = vcmp.eq.s32.totalorder %v3070_v4, %v3334_v16 }
 0x39b   : > { %vm3905_vm8 = vcmp.eq.s32.totalorder %v3082_v61, %v3374_v45  ;;  %vm1194_vm5 = vcmp.eq.s32.totalorder %v3070_v4, %v3374_v45  ;;  %v1553_v26 = vadd.f32 %v1552_v22, %v1504_v55  ;;  %v3575_v55 = vsel %vm1320_vm11, 1.0, %v2425_v48 }
 0x39c   : > { %2070 = vmatprep.mubr.msk.f32.mxu0 %vm3905_vm8, %v2426_v14  ;;  %vm1313_vm8 = vcmp.lt.s32.totalorder %v1297_v46, 288  ;;  %v1288_v46 = vadd.s32 104, %v3194_v3  ;;  %v1533_v25 = vadd.f32 %v1532_v10, %v1505_v40  ;;  %v2017_v22 = vsel %vm3912_vm7, 1.0, %v2425_v48 }
 0x39d   : > { %2071 = vmatmul.mubr.msk.f32.gmra.mxu0 %vm1194_vm5, %v2426_v14  ;;  %v3433_v58 = vsel %vm1313_vm8, 1.0, %v2425_v48  ;;  %v1554_v28 = vadd.f32 %v1553_v26, %v1506_v43  ;;  %vm1126_vm11 = vcmask 589312   ;;  %v2019_v26 = vsel %vm3914_vm1, 1.0, %v2425_v48 }
 0x39e   : > { %v1305_v39 = vadd.s32 %v3338_v18, %v1288_v46  ;;  %v3566_v46 = vsel %vm1319_vm4, 1.0, %v2425_v48  ;;  %vm3913_vm4 = vcmp.eq.s32.totalorder %v3082_v61, %v3312_v9  ;;  %v1534_v40 = vadd.f32 %v1533_v25, %v1507_v36 }
 0x39f   : > { %v2018_v10 = vsel %vm3913_vm4, 1.0, %v2425_v48  ;;  %v1555_v36 = vadd.f32 %v1554_v28, %v1508_v56  ;;  %vm3915_vm7 = vcmp.eq.s32.totalorder %v3082_v61, %v3334_v16  ;;  %v1509_v52 = vmul.f32 %v3433_v58, %v2015_v32 }
 0x3a0   : > { %vm1321_vm2 = vcmp.lt.s32.totalorder %v1305_v39, 288  ;;  %v2020_v0 = vsel %vm3915_vm7, 1.0, %v2425_v48  ;;  %v1511_v20 = vmul.f32 %v3450_v27, %v2017_v22  ;;  %v1306_v25 = vadd.s32 %v3338_v18, %v1289_v7 }
 0x3a1   : > { %v3617_v43 = vsel %vm1321_vm2, 1.0, %v2425_v48  ;;  %v2021_v39 = vsel %vm1194_vm5, 1.0, %v2425_v48  ;;  %vm1133_vm2 = vcmask 654912   ;;  %v1510_v28 = vmul.f32 %v3433_v58, %v2016_v57 }
 0x3a2   : > { %v3442_v19 = vpop.permute.xlu1 %1026  ;;  %v1512_v49 = vmul.f32 %v3450_v27, %v2018_v10  ;;  %v1104_v32 = vrot.slane %v3280_v6, %v1103_v31  ;;  %vm3916_vm4 = vcmp.eq.s32.totalorder %v3082_v61, %v3374_v45  ;;  %v1513_v22 = vmul.f32 %v3475_v44, %v2019_v26 }
 0x3a3   : > { %vm1199_vm9 = vcmp.eq.s32.totalorder %v3082_v61, %v3442_v19  ;;  %vm1198_vm8 = vcmp.eq.s32.totalorder %v3070_v4, %v3442_v19  ;;  %v2022_v7 = vsel %vm3916_vm4, 1.0, %v2425_v48  ;;  %v1535_v47 = vadd.f32 %v1534_v40, %v1509_v52 }
 0x3a4   : > { %2074 = vmatprep.mubr.msk.f32.mxu1 %vm1199_vm9, %v2426_v14  ;;  %v1099_v56 = vsel %vm1098_vm13, %v1097_v42, %v3267_v62  ;;  %v1111_v57 = vrot.slane %v3312_v9, %v1110_v24  ;;  %v1514_v53 = vmul.f32 %v3475_v44, %v2020_v0  ;;  %v1556_v10 = vadd.f32 %v1555_v36, %v1510_v28 }
 0x3a5   : > { %2075 = vmatmul.mubr.msk.f32.gmra.mxu1 %vm1198_vm8, %v2426_v14  ;;  %v1118_v6 = vrot.slane %v3334_v16, %v1117_v33  ;;  %v1536_v31 = vadd.f32 %v1535_v47, %v1511_v20  ;;  %v1515_v26 = vmul.f32 %v3506_v41, %v2021_v39  ;;  %vm1322_vm5 = vcmp.lt.s32.totalorder %v1306_v25, 288 }
 0x3a6   : > { %v1125_v42 = vrot.slane %v3374_v45, %v1124_v23  ;;  %v3664_v9 = vadd.s32 4294967176, %v3070_v4  ;;  %v1557_v30 = vadd.f32 %v1556_v10, %v1512_v49  ;;  %v1516_v24 = vmul.f32 %v3506_v41, %v2022_v7 }
 0x3a7   : > { %v1106_v11 = vsel %vm1105_vm12, %v1104_v32, %v1099_v56  ;;  %v1537_v16 = vadd.f32 %v1536_v31, %v1513_v22  ;;  %vm3917_vm7 = vcmp.eq.s32.totalorder %v3070_v4, %v3336_v17  ;;  %vm1140_vm4 = vcmask 720512  }
 0x3a8   : > { %v1113_v33 = vsel %vm1112_vm15, %v1111_v57, %v1106_v11  ;;  %v2023_v45 = vsel %vm3917_vm7, 1.0, %v2425_v48  ;;  %v1558_v23 = vadd.f32 %v1557_v30, %v1514_v53  ;;  %vm3918_vm12 = vcmp.eq.s32.totalorder %v3082_v61, %v3336_v17 }
 0x3a9   : > { %v1120_v47 = vsel %vm1119_vm3, %v1118_v6, %v1113_v33  ;;  %v2024_v49 = vsel %vm3918_vm12, 1.0, %v2425_v48  ;;  %v2025_v40 = vsel %vm1198_vm8, 1.0, %v2425_v48  ;;  %vm1147_vm15 = vcmask 786112  }
 0x3aa   : > { %v3514_v51 = vpop.permute.xlu1 %1034  ;;  %v1538_v36 = vadd.f32 %v1537_v16, %v1515_v26  ;;  %v1127_v0 = vsel %vm1126_vm11, %v1125_v42, %v1120_v47  ;;  %v2026_v52 = vsel %vm1199_vm9, 1.0, %v2425_v48  ;;  %vm1154_vm3 = vcmask 851712  }
 0x3ab   : > { %vm1201_vm6 = vcmp.eq.s32.totalorder %v3082_v61, %v3514_v51  ;;  %vm1200_vm10 = vcmp.eq.s32.totalorder %v3070_v4, %v3514_v51  ;;  %v1559_v20 = vadd.f32 %v1558_v23, %v1516_v24  ;;  %v3698_v39 = vsel %vm1322_vm5, 1.0, %v2425_v48 }
 0x3ac   : > { %2076 = vmatprep.mubr.msk.f32.mxu1 %vm1201_vm6, %v2426_v14  ;;  %v1132_v56 = vrot.slane %v3336_v17, %v1131_v54  ;;  %v2027_v28 = vsel %vm1200_vm10, 1.0, %v2425_v48  ;;  %vm1161_vm8 = vcmask 917312   ;;  %v1173_v32 = vsub.s32 %v3664_v9, %v3194_v3 }
 0x3ad   : > { %2077 = vmatmul.mubr.msk.f32.gmra.mxu1 %vm1200_vm10, %v2426_v14  ;;  %v1517_v7 = vmul.f32 %v3478_v60, %v2023_v45  ;;  %v2028_v25 = vsel %vm1201_vm6, 1.0, %v2425_v48  ;;  %v1518_v37 = vmul.f32 %v3478_v60, %v2024_v49  ;;  %v1307_v17 = vadd.s32 %v3338_v18, %v1290_v13 }
 0x3ae   : > { %v1519_v54 = vmul.f32 %v3559_v29, %v2025_v40  ;;  %v1134_v22 = vsel %vm1133_vm2, %v1132_v56, %v1127_v0  ;;  %v1520_v53 = vmul.f32 %v3559_v29, %v2026_v52  ;;  %v1139_v6 = vrot.slane %v3442_v19, %v1138_v21 }
 0x3af   : > { %v1539_v10 = vadd.f32 %v1538_v36, %v1517_v7  ;;  %v1521_v26 = vmul.f32 %v3566_v46, %v2027_v28  ;;  %v1560_v42 = vadd.f32 %v1559_v20, %v1518_v37  ;;  %v1522_v35 = vmul.f32 %v3566_v46, %v2028_v25 }
 0x3b0   : > { %v1146_v19 = vrot.slane %v3514_v51, %v1145_v15  ;;  %v3919_v11 = vsub.s32 %v3517_v12, %v3194_v3  ;;  %v3920_v15 = vsub.s32 %v3538_v5, %v3194_v3  ;;  %v1141_v12 = vsel %vm1140_vm4, %v1139_v6, %v1134_v22 }
 0x3b1   : > { %v1540_v30 = vadd.f32 %v1539_v10, %v1519_v54  ;;  %v1561_v38 = vadd.f32 %v1560_v42, %v1520_v53  ;;  %vm1323_vm10 = vcmp.lt.s32.totalorder %v1307_v17, 288  ;;  %v3921_v36 = vsub.s32 %v3578_v63, %v3194_v3 }
 0x3b2   : > { %v3593_v50 = vpop.permute.xlu1 %1042  ;;  %v1148_v40 = vsel %vm1147_vm15, %v1146_v19, %v1141_v12  ;;  %vm1168_vm11 = vcmask 982912   ;;  %v3771_v25 = vsel %vm1323_vm10, 1.0, %v2425_v48  ;;  %v2427_v42 = vmov 1966171168  }
 0x3b3   : > { %vm1203_vm14 = vcmp.eq.s32.totalorder %v3082_v61, %v3593_v50  ;;  %vm1202_vm0 = vcmp.eq.s32.totalorder %v3070_v4, %v3593_v50  ;;  %v1153_v16 = vrot.slane %v3593_v50, %v3919_v11  ;;  %v1541_v47 = vadd.f32 %v1540_v30, %v1521_v26 }
 0x3b4   : > { %2078 = vmatprep.mubr.msk.f32.mxu1 %vm1203_vm14, %v2426_v14  ;;  %v2029_v57 = vsel %vm1202_vm0, 1.0, %v2425_v48  ;;  %v2030_v18 = vsel %vm1203_vm14, 1.0, %v2425_v48  ;;  %v1562_v49 = vadd.f32 %v1561_v38, %v1522_v35  ;;  %vm1175_vm14 = vcmask 1048512  }
 0x3b5   : > { %2079 = vmatmul.mubr.msk.f32.gmra.mxu1 %vm1202_vm0, %v2426_v14  ;;  %v1523_v24 = vmul.f32 %v3575_v55, %v2029_v57  ;;  %v1524_v51 = vmul.f32 %v3575_v55, %v2030_v18 }
 0x3b7   : > { %v1542_v52 = vadd.f32 %v1541_v47, %v1523_v24  ;;  %v1563_v20 = vadd.f32 %v1562_v49, %v1524_v51  ;;  %v3923_v47 = vlaneseq }
 0x3b9   : > { %vm3788_vm5 = vcmp.lt.s32.totalorder %v3923_v47, 256 }
 0x3ba   : > { %v1051_v62 = vpop.permute.xlu1 %1050 }
 0x3bb   : > { %vm1205_vm13 = vcmp.eq.s32.totalorder %v3082_v61, %v1051_v62  ;;  %vm1204_vm1 = vcmp.eq.s32.totalorder %v3070_v4, %v1051_v62  ;;  %v1160_v45 = vrot.slane %v1051_v62, %v3920_v15  ;;  %v1155_v62 = vsel %vm1154_vm3, %v1153_v16, %v1148_v40 }
 0x3bc   : > { %2080 = vmatprep.mubr.msk.f32.mxu1 %vm1205_vm13, %v2426_v14  ;;  %v2031_v9 = vsel %vm1204_vm1, 1.0, %v2425_v48  ;;  %v2032_v21 = vsel %vm1205_vm13, 1.0, %v2425_v48  ;;  %vm1453_vm13 = vcmask 7168  }
 0x3bd   : > { %2081 = vmatmul.mubr.msk.f32.gmra.mxu1 %vm1204_vm1, %v2426_v14  ;;  %v1525_v23 = vmul.f32 %v3617_v43, %v2031_v9  ;;  %v1526_v50 = vmul.f32 %v3617_v43, %v2032_v21  ;;  %v1162_v28 = vsel %vm1161_vm8, %v1160_v45, %v1155_v62  ;;  %vm1496_vm1 = vcmask 0  }
 0x3bf   : > { %v1543_v37 = vadd.f32 %v1542_v52, %v1525_v23  ;;  %v1564_v17 = vadd.f32 %v1563_v20, %v1526_v50  ;;  %v1361_v49 = vpop.xlane.xlu0 %1360 }
 0x3c2   : > { %v1059_v31 = vpop.permute.xlu1 %1058 }
 0x3c3   : > { %vm1207_vm9 = vcmp.eq.s32.totalorder %v3082_v61, %v1059_v31  ;;  %vm1206_vm6 = vcmp.eq.s32.totalorder %v3070_v4, %v1059_v31  ;;  %v1167_v0 = vrot.slane %v1059_v31, %v3921_v36  ;;  %v1367_v40 = vpop.xlane.xlu0 %1366 }
 0x3c4   : > { %2082 = vmatprep.mubr.msk.f32.mxu1 %vm1207_vm9, %v2426_v14  ;;  %v2033_v33 = vsel %vm1206_vm6, 1.0, %v2425_v48  ;;  %v2034_v13 = vsel %vm1207_vm9, 1.0, %v2425_v48 }
 0x3c5   : > { %2083 = vmatmul.mubr.msk.f32.gmra.mxu1 %vm1206_vm6, %v2426_v14  ;;  %v1527_v5 = vmul.f32 %v3698_v39, %v2033_v33  ;;  %v1528_v56 = vmul.f32 %v3698_v39, %v2034_v13  ;;  %v1169_v54 = vsel %vm1168_vm11, %v1167_v0, %v1162_v28  ;;  %v1498_v13 = vld [vmem:[#allocation3] sm:$0x3]  ;;  %v1406_v0 = vmul.f32 2.0, %v1361_v49 }
 0x3c7   : > { %v1544_v53 = vadd.f32 %v1543_v37, %v1527_v5  ;;  %v1565_v18 = vadd.f32 %v1564_v17, %v1528_v56  ;;  %v1373_v36 = vpop.xlane.xlu0 %1372  ;;  %v1422_v52 = vsub.f32 2.0, %v1406_v0  ;;  %v1408_v5 = vmul.f32 2.0, %v1367_v40 }
 0x3c8   : > { %v1410_v17 = vmul.f32 2.0, %v1373_v36 }
 0x3c9   : > { %v1438_v28 = vmul.f32 %v3404_v34, %v1422_v52 }
 0x3ca   : > { %v1067_v7 = vpop.permute.xlu1 %1066 }
 0x3cb   : > { %v1174_v63 = vrot.slane %v1067_v7, %v1173_v32  ;;  %vm1209_vm0 = vcmp.eq.s32.totalorder %v3082_v61, %v1067_v7  ;;  %vm1208_vm2 = vcmp.eq.s32.totalorder %v3070_v4, %v1067_v7  ;;  %v1424_v7 = vsub.f32 2.0, %v1408_v5 }
 0x3cc   : > { %v2036_v22 = vsel %vm1209_vm0, 1.0, %v2425_v48  ;;  %2084 = vmatprep.mubr.msk.f32.mxu1 %vm1209_vm0, %v2426_v14  ;;  %v2035_v57 = vsel %vm1208_vm2, 1.0, %v2425_v48  ;;  %v1577_v48 = vunpack.c.l.s4 %v2427_v42 }
 0x3cd   : > { %v1176_v10 = vsel %vm1175_vm14, %v1174_v63, %v1169_v54  ;;  %2085 = vmatmul.mubr.msk.f32.gmra.mxu1 %vm1208_vm2, %v2426_v14  ;;  %v1529_v6 = vmul.f32 %v3771_v25, %v2035_v57  ;;  %v1530_v32 = vmul.f32 %v3771_v25, %v2036_v22 }
 0x3ce   : > { %1177 = vst [vmem:[%s3922_s18] sm:$0x1] %v1176_v10  ;;  %v1578_v21 = vunpack.c.0.s8 %v1577_v48  ;;  %v1455_v10 = vsel %vm1453_vm13, %v1438_v28, 0.0 }
 0x3cf   : > { %v1545_v4 = vadd.f32 %v1544_v53, %v1529_v6  ;;  %v1566_v61 = vadd.f32 %v1565_v18, %v1530_v32  ;;  %v1440_v6 = vmul.f32 %v3418_v2, %v1424_v7  ;;  %v1426_v18 = vsub.f32 2.0, %v1410_v17 }
 0x3d0   : > { %v1581_v33 = vsub.s32 %v1578_v21, %v3194_v3  ;;  %v1379_v3 = vpop.xlane.xlu0 %1378 }
 0x3d1   : > { %v1546_v31 = vrot.slane %v1545_v4, 4  ;;  %v1567_v26 = vrot.slane %v1566_v61, 4 }
 0x3d3   : > { %v1547_v9 = vadd.f32 %v1546_v31, %v1545_v4  ;;  %v1568_v35 = vadd.f32 %v1567_v26, %v1566_v61  ;;  %v1412_v4 = vmul.f32 2.0, %v1379_v3 }
 0x3d4   : > { %v1385_v37 = vpop.xlane.xlu0 %1384 }
 0x3d5   : > { %v1548_v19 = vrot.slane %v1547_v9, 2  ;;  %v1569_v14 = vrot.slane %v1568_v35, 2  ;;  %v1428_v21 = vsub.f32 2.0, %v1412_v4 }
 0x3d7   : > { %v1549_v30 = vadd.f32 %v1548_v19, %v1547_v9  ;;  %v1570_v24 = vadd.f32 %v1569_v14, %v1568_v35  ;;  %v1414_v9 = vmul.f32 2.0, %v1385_v37  ;;  %v1442_v14 = vmul.f32 %v3433_v58, %v1426_v18 }
 0x3d8   : > { %v1391_v31 = vpop.xlane.xlu0 %1390 }
 0x3d9   : > { %v1550_v11 = vrot.slane %v1549_v30, 1  ;;  %v1571_v16 = vrot.slane %v1570_v24, 1 }
 0x3db   : > { %v1551_v38 = vadd.f32 %v1550_v11, %v1549_v30  ;;  %v1572_v51 = vadd.f32 %v1571_v16, %v1570_v24  ;;  %v1430_v16 = vsub.f32 2.0, %v1414_v9 }
 0x3dd   : > { %v1575_v15 = vcombine.low %v1551_v38, %v1572_v51  ;;  %v1397_v38 = vpop.xlane.xlu0 %1396  ;;  %v1446_v49 = vmul.f32 %v3478_v60, %v1430_v16 }
 0x3de   : > { %v1418_v52 = vmul.f32 2.0, %v1397_v38 }
 0x3df   : > { %v1582_v45 = vrot.slane %v1575_v15, %v1581_v33  ;;  %v1471_v28 = vsel %vm1453_vm13, %v1446_v49, 0.0 }
 0x3e1   : > { %v1589_v23 = vrot.slane %v1582_v45, %v1581_v33  ;;  %v1416_v33 = vmul.f32 2.0, %v1391_v31  ;;  %v1463_v45 = vsel %vm1453_vm13, %v1442_v14, 0.0 }
 0x3e3   : > { %v1591_v50 = vadd.f32 %v1589_v23, %v1498_v13  ;;  %v1444_v13 = vmul.f32 %v3475_v44, %v1428_v21  ;;  %v1432_v40 = vsub.f32 2.0, %v1416_v33  ;;  %v3829_v21 = vld [vmem:[%s3892_s5] ss:$0 sm:$0xff] }
 0x3e5   : > { %1596 = vst.msk [vmem:[#allocation3] sm:$0x3] %vm3788_vm5, %v1591_v50  ;;  %v1467_v3 = vsel %vm1453_vm13, %v1444_v13, 0.0  ;;  %v1448_v7 = vmul.f32 %v3566_v46, %v1432_v40 }
 0x3fc   : > { %v1358_v62 = vpop.xlane.xlu1 %1357 }
 0x3fd   : > { %v1405_v20 = vmul.f32 2.0, %v1358_v62 }
 0x3ff   : > { %v1421_v56 = vsub.f32 2.0, %v1405_v20  ;;  %v1403_v20 = vpop.xlane.xlu0 %1402 }
 0x400   : > { %v1364_v63 = vpop.xlane.xlu1 %1363  ;;  %v1420_v17 = vmul.f32 2.0, %v1403_v20 }
 0x401   : > { %v1437_v54 = vmul.f32 %v3408_v59, %v1421_v56  ;;  %v1407_v22 = vmul.f32 2.0, %v1364_v63  ;;  %v1459_v59 = vsel %vm1453_vm13, %v1440_v6, 0.0  ;;  %v1434_v63 = vsub.f32 2.0, %v1418_v52 }
 0x402   : > { %v1436_v4 = vsub.f32 2.0, %v1420_v17 }
 0x403   : > { %v1454_v57 = vsel %vm1453_vm13, %v1437_v54, 0.0  ;;  %v1423_v53 = vsub.f32 2.0, %v1407_v22  ;;  %v1450_v18 = vmul.f32 %v3617_v43, %v1434_v63 }
 0x404   : > { %v1370_v32 = vpop.xlane.xlu1 %1369  ;;  %v1456_v26 = vadd.f32 %v1455_v10, %v1454_v57  ;;  %v1475_v10 = vsel %vm1453_vm13, %v1448_v7, 0.0 }
 0x405   : > { %v1439_v34 = vmul.f32 %v3421_v8, %v1423_v53  ;;  %v1409_v61 = vmul.f32 2.0, %v1370_v32 }
 0x407   : > { %v1457_v42 = vsel %vm1453_vm13, %v1439_v34, 0.0  ;;  %v1425_v48 = vsub.f32 2.0, %v1409_v61 }
 0x408   : > { %v1458_v35 = vadd.f32 %v1457_v42, %v1456_v26  ;;  %v1376_v19 = vpop.xlane.xlu1 %1375  ;;  %v1479_v42 = vsel %vm1453_vm13, %v1450_v18, 0.0 }
 0x409   : > { %v1441_v2 = vmul.f32 %v3436_v1, %v1425_v48  ;;  %v1411_v30 = vmul.f32 2.0, %v1376_v19  ;;  %v1452_v48 = vmul.f32 %v3771_v25, %v1436_v4 }
 0x40a   : > { %v1460_v24 = vadd.f32 %v1459_v59, %v1458_v35 }
 0x40b   : > { %v1461_v8 = vsel %vm1453_vm13, %v1441_v2, 0.0  ;;  %v1427_v11 = vsub.f32 2.0, %v1411_v30 }
 0x40c   : > { %v1462_v51 = vadd.f32 %v1461_v8, %v1460_v24  ;;  %v1382_v15 = vpop.xlane.xlu1 %1381 }
 0x40d   : > { %v1443_v23 = vmul.f32 %v3450_v27, %v1427_v11  ;;  %v1413_v58 = vmul.f32 2.0, %v1382_v15 }
 0x40e   : > { %v1464_v47 = vadd.f32 %v1463_v45, %v1462_v51 }
 0x40f   : > { %v1465_v1 = vsel %vm1453_vm13, %v1443_v23, 0.0  ;;  %v1429_v50 = vsub.f32 2.0, %v1413_v58 }
 0x410   : > { %v1466_v36 = vadd.f32 %v1465_v1, %v1464_v47  ;;  %v1388_v0 = vpop.xlane.xlu1 %1387 }
 0x411   : > { %v1445_v5 = vmul.f32 %v3506_v41, %v1429_v50  ;;  %v1415_v62 = vmul.f32 2.0, %v1388_v0 }
 0x412   : > { %v1468_v44 = vadd.f32 %v1467_v3, %v1466_v36 }
 0x413   : > { %v1469_v27 = vsel %vm1453_vm13, %v1445_v5, 0.0  ;;  %v1431_v56 = vsub.f32 2.0, %v1415_v62 }
 0x414   : > { %v1470_v37 = vadd.f32 %v1469_v27, %v1468_v44  ;;  %v1394_v60 = vpop.xlane.xlu1 %1393 }
 0x415   : > { %v1447_v54 = vmul.f32 %v3559_v29, %v1431_v56  ;;  %v1417_v22 = vmul.f32 2.0, %v1394_v60 }
 0x416   : > { %v1472_v57 = vadd.f32 %v1471_v28, %v1470_v37 }
 0x417   : > { %v1473_v41 = vsel %vm1453_vm13, %v1447_v54, 0.0  ;;  %v1433_v53 = vsub.f32 2.0, %v1417_v22 }
 0x418   : > { %v1474_v6 = vadd.f32 %v1473_v41, %v1472_v57  ;;  %v1400_v32 = vpop.xlane.xlu1 %1399 }
 0x419   : > { %v1449_v46 = vmul.f32 %v3575_v55, %v1433_v53  ;;  %v1419_v34 = vmul.f32 2.0, %v1400_v32  ;;  %v1483_v55 = vsel %vm1453_vm13, %v1452_v48, 0.0 }
 0x41a   : > { %v1476_v61 = vadd.f32 %v1475_v10, %v1474_v6 }
 0x41b   : > { %v1477_v31 = vsel %vm1453_vm13, %v1449_v46, 0.0  ;;  %v1435_v26 = vsub.f32 2.0, %v1419_v34 }
 0x41c   : > { %v1478_v29 = vadd.f32 %v1477_v31, %v1476_v61 }
 0x41d   : > { %v1451_v59 = vmul.f32 %v3698_v39, %v1435_v26 }
 0x41e   : > { %v1480_v9 = vadd.f32 %v1479_v42, %v1478_v29 }
 0x41f   : > { %v1481_v43 = vsel %vm1453_vm13, %v1451_v59, 0.0 }
 0x420   : > { %v1482_v35 = vadd.f32 %v1481_v43, %v1480_v9 }
 0x422   : > { %v1484_v19 = vadd.f32 %v1483_v55, %v1482_v35 }
 0x424   : > { %1485 = vadd.xlane.f32.xlu1 %v1484_v19 }
 0x431   : > { %v2153_v14 = vpop.f32.mrf.mxu0 }
 0x433   : > { %v2154_v2 = vpop.f32.mrf.mxu0 }
 0x434   : > { %v2155_v25 = vadd.f32 %v2154_v2, %v2153_v14 }
 0x435   : > { %v2156_v30 = vpop.f32.mrf.mxu0 }
 0x436   : > { %v1703_v39 = vadd.f32 %v2155_v25, %v3829_v21 }
 0x437   : > { %v2157_v24 = vpop.f32.mrf.mxu0 }
 0x438   : > { %1781 = vst [vmem:[%s2530_s29] sm:$0xff] %v1703_v39  ;;  %v2158_v8 = vadd.f32 %v2157_v24, %v2156_v30 }
 0x43a   : > { %v1708_v11 = vadd.f32 %v2158_v8, %v3829_v21 }
 0x43c   : > { %1782 = vst [vmem:[%s2530_s29 + $0x8] sm:$0xff] %v1708_v11 }
 0x43d   : > { %v2159_v16 = vpop.f32.mrf.mxu0 }
 0x43f   : > { %v2160_v33 = vpop.f32.mrf.mxu0 }
 0x440   : > { %v2161_v38 = vadd.f32 %v2160_v33, %v2159_v16  ;;  %v1404_v33 = vld [vmem:[#allocation2] sm:$0x1] }
 0x441   : > { %v2162_v51 = vpop.f32.mrf.mxu0 }
 0x442   : > { %v1713_v15 = vadd.f32 %v2161_v38, %v3829_v21 }
 0x443   : > { %v2163_v45 = vpop.f32.mrf.mxu0 }
 0x444   : > { %1783 = vst [vmem:[%s2530_s29 + $0x10] sm:$0xff] %v1713_v15  ;;  %v2164_v13 = vadd.f32 %v2163_v45, %v2162_v51 }
 0x445   : > { %v2165_v23 = vpop.f32.mrf.mxu0 }
 0x446   : > { %v1718_v58 = vadd.f32 %v2164_v13, %v3829_v21 }
 0x447   : > { %v2166_v47 = vpop.f32.mrf.mxu0 }
 0x448   : > { %1784 = vst [vmem:[%s2530_s29 + $0x18] sm:$0xff] %v1718_v58  ;;  %v2167_v1 = vadd.f32 %v2166_v47, %v2165_v23 }
 0x449   : > { %v2168_v50 = vpop.f32.mrf.mxu0 }
 0x44a   : > { %v1723_v49 = vadd.f32 %v2167_v1, %v3829_v21 }
 0x44b   : > { %v2169_v40 = vpop.f32.mrf.mxu0 }
 0x44c   : > { %1785 = vst [vmem:[%s2530_s29 + $0x20] sm:$0xff] %v1723_v49  ;;  %v2170_v36 = vadd.f32 %v2169_v40, %v2168_v50 }
 0x44d   : > { %v2171_v0 = vpop.f32.mrf.mxu0 }
 0x44e   : > { %v1728_v3 = vadd.f32 %v2170_v36, %v3829_v21 }
 0x44f   : > { %v2172_v52 = vpop.f32.mrf.mxu0 }
 0x450   : > { %1786 = vst [vmem:[%s2530_s29 + $0x28] sm:$0xff] %v1728_v3  ;;  %v2173_v5 = vadd.f32 %v2172_v52, %v2171_v0 }
 0x452   : > { %v1733_v62 = vadd.f32 %v2173_v5, %v3829_v21 }
 0x454   : > { %1787 = vst [vmem:[%s2530_s29 + $0x30] sm:$0xff] %v1733_v62 }
 0x455   : > { %v2174_v20 = vpop.f32.mrf.mxu0  ;;  %v2180_v44 = vpop.f32.mrf.mxu1 }
 0x457   : > { %v2175_v27 = vpop.f32.mrf.mxu0  ;;  %v2181_v28 = vpop.f32.mrf.mxu1 }
 0x458   : > { %v2176_v56 = vadd.f32 %v2175_v27, %v2174_v20  ;;  %v2182_v7 = vadd.f32 %v2181_v28, %v2180_v44 }
 0x45a   : > { %v1738_v37 = vadd.f32 %v2176_v56, %v3829_v21  ;;  %v1748_v60 = vadd.f32 %v2182_v7, %v3829_v21 }
 0x45c   : > { %1788 = vst [vmem:[%s2530_s29 + $0x38] sm:$0xff] %v1738_v37  ;;  %1790 = vst [vmem:[%s2530_s29 + $0x48] sm:$0xff] %v1748_v60 }
 0x45d   : > { %v2177_v63 = vpop.f32.mrf.mxu0 }
 0x45f   : > { %v2178_v17 = vpop.f32.mrf.mxu0 }
 0x460   : > { %v2179_v54 = vadd.f32 %v2178_v17, %v2177_v63 }
 0x462   : > { %v1743_v22 = vadd.f32 %v2179_v54, %v3829_v21 }
 0x464   : > { %1789 = vst [vmem:[%s2530_s29 + $0x40] sm:$0xff] %v1743_v22 }
 0x465   : > { %v2183_v57 = vpop.f32.mrf.mxu1 }
 0x467   : > { %v2184_v41 = vpop.f32.mrf.mxu1 }
 0x468   : > { %v2185_v53 = vadd.f32 %v2184_v41, %v2183_v57 }
 0x46a   : > { %v1753_v10 = vadd.f32 %v2185_v53, %v3829_v21 }
 0x46c   : > { %1791 = vst [vmem:[%s2530_s29 + $0x50] sm:$0xff] %v1753_v10 }
 0x46d   : > { %v2186_v6 = vpop.f32.mrf.mxu1 }
 0x46f   : > { %v2187_v32 = vpop.f32.mrf.mxu1 }
 0x470   : > { %v2188_v18 = vadd.f32 %v2187_v32, %v2186_v6 }
 0x472   : > { %v1758_v4 = vadd.f32 %v2188_v18, %v3829_v21 }
 0x474   : > { %1792 = vst [vmem:[%s2530_s29 + $0x58] sm:$0xff] %v1758_v4 }
 0x475   : > { %v2189_v46 = vpop.f32.mrf.mxu1 }
 0x477   : > { %v2190_v34 = vpop.f32.mrf.mxu1 }
 0x478   : > { %v2191_v61 = vadd.f32 %v2190_v34, %v2189_v46 }
 0x47a   : > { %v1763_v31 = vadd.f32 %v2191_v61, %v3829_v21 }
 0x47c   : > { %1793 = vst [vmem:[%s2530_s29 + $0x60] sm:$0xff] %v1763_v31 }
 0x47d   : > { %v2192_v26 = vpop.f32.mrf.mxu1 }
 0x47f   : > { %v2193_v29 = vpop.f32.mrf.mxu1 }
 0x480   : > { %v2194_v42 = vadd.f32 %v2193_v29, %v2192_v26 }
 0x482   : > { %v1768_v48 = vadd.f32 %v2194_v42, %v3829_v21 }
 0x484   : > { %1794 = vst [vmem:[%s2530_s29 + $0x68] sm:$0xff] %v1768_v48 }
 0x485   : > { %v2195_v59 = vpop.f32.mrf.mxu1 }
 0x487   : > { %v2196_v9 = vpop.f32.mrf.mxu1 }
 0x488   : > { %v2197_v43 = vadd.f32 %v2196_v9, %v2195_v59 }
 0x48a   : > { %v1773_v35 = vadd.f32 %v2197_v43, %v3829_v21 }
 0x48c   : > { %1795 = vst [vmem:[%s2530_s29 + $0x70] sm:$0xff] %v1773_v35 }
 0x48d   : > { %v2198_v55 = vpop.f32.mrf.mxu1 }
 0x48f   : > { %v2199_v19 = vpop.f32.mrf.mxu1 }
 0x490   : > { %v2200_v14 = vadd.f32 %v2199_v19, %v2198_v55 }
 0x492   : > { %v1778_v2 = vadd.f32 %v2200_v14, %v3829_v21 }
 0x494   : > { %1796 = vst [vmem:[%s2530_s29 + $0x78] sm:$0xff] %v1778_v2 }
 0x4ad   : > { %v1486_v25 = vpop.xlane.xlu1 %1485 }
 0x4ae   : > { %v1487_v39 = vrot.slane %v1486_v25, 4 }
 0x4b0   : > { %v1488_v30 = vadd.f32 %v1487_v39, %v1486_v25 }
 0x4b2   : > { %v1489_v24 = vrot.slane %v1488_v30, 2 }
 0x4b4   : > { %v1490_v8 = vadd.f32 %v1489_v24, %v1488_v30 }
 0x4b6   : > { %v1491_v11 = vrot.slane %v1490_v8, 1 }
 0x4b8   : > { %v1492_v16 = vadd.f32 %v1491_v11, %v1490_v8 }
 0x4ba   : > { %2289 = vpush %v1492_v16 }
 0x4eb   : > { %s2290_s15 = spop %2289  ;;  %1800 = sbr.rel (%p2086_p9) target bundleno = 1272 (0x4f8), region = 52 }
 0x4ec   : > { %v1494_v38 = vstv %s2290_s15 }
 0x4ed   : > { %v1495_v51 = vadd.f32 %v1494_v38, %v1404_v33 }
 0x4ef   : > { %1497 = vst.msk [vmem:[#allocation2] sm:$0x1] %vm1496_vm1, %v1495_v51 }
 0x4f0   : > { %v1803_v21 = vld [vmem:[#allocation3] sm:$0x3] }
 0x4f1   : > { %1804 = vst.msk [vmem:[%s2542_s24] sm:$0x3] %vm3788_vm5, %v1803_v21 }
 0x4f6   : > { %v1801_v15 = vld [vmem:[#allocation2] sm:$0x1] }
 0x4f7   : > { %1802 = vst.msk [vmem:[%s404_s20] sm:$0x1] %vm1496_vm1, %v1801_v15 }
 0x4f8 PF: > { %s20_s13 = sadd.s32 1, %s2422_s13   ;;  %s3926_s27 = sld [smem:[#allocation4_spill]] }
 0x4f9   : > { %p17_p10 = scmp.ge.s32.totalorder %s20_s13, 6   ;;  %s3927_s30 = smov %s2414_s11 }
 0x4fa   : > { %s3928_s10 = smov %s2418_s12  ;;  %s3929_s11 = smov %s3932_s14 }
 0x4fb   :  { %19 = sbr.rel (!%p17_p10) target bundleno = 3 (0x3), region = 118 }
 0x4fe   : > { %s3930_s12 = smov %s3926_s27 }

</bundles_post_ra>
